<compile_context>
chip_gen: v6e
topology: v6e:2x2x1
jax: 0.10.0
libtpu: 0.0.40
codegen_flags: <defaults>
</compile_context>

<pallas_src>
import functools

import jax
import jax.numpy as jnp
from jax.experimental import pallas as pl
from jax.experimental.pallas import tpu as pltpu

F32 = jnp.float32
BF16 = jnp.bfloat16

# ---- GraphEncDec default hyper-parameters ----
INPUT_DIM = 23          # node feature dim
EMB_DIM = 32            # hidden_dim_GCN
NUM_RELATION = 1
NUM_ANGLE_BIN = 8
NUM_LAYERS = 6
N_CLASSES = 6
BN_EPS = 1e-5

BLOCK_M = 1024                    # row tile (1024 amortizes the ~0.35us per-step cost)
VMEM_LIMIT = 48 * 1024 * 1024     # <= v7x 64 MiB physical; plenty on v5e/v6e (128 MiB)


def _ru(x, m):
    return ((x + m - 1) // m) * m


# ----------------------------------------------------------------------------
# Fused, tiled Pallas kernel:
#   o  = maybe_affine( maybe_relu(x1 @ W1 [+ x2 @ W2] + b) [+ res] )
#   o2 = o @ W_out2 + b_out2      (optional fused decoder head)
# ----------------------------------------------------------------------------
def _fused_kernel(relu, has_x2, has_res, has_affine, has_out2, *refs):
    it = iter(refs)
    x1_ref, w1_ref = next(it), next(it)
    if has_x2:
        x2_ref, w2_ref = next(it), next(it)
    b_ref = next(it)
    if has_res:
        res_ref = next(it)
    if has_affine:
        scale_ref, shift_ref = next(it), next(it)
    if has_out2:
        wd_ref, bd_ref = next(it), next(it)
    o_ref = next(it)
    if has_out2:
        o2_ref = next(it)

    # bf16 MXU operands (cast on the resident VMEM tile: no wrapper cast pass),
    # f32 accumulation; all epilogue arithmetic stays f32.
    y = jnp.dot(x1_ref[...].astype(BF16), w1_ref[...],
                preferred_element_type=jnp.float32)
    if has_x2:  # concat-free "combine": linear(update) + self_loop(input)
        y = y + jnp.dot(x2_ref[...].astype(BF16), w2_ref[...],
                        preferred_element_type=jnp.float32)
    y = y + b_ref[...]
    if relu:
        y = jnp.maximum(y, 0.0)
    if has_res:
        y = y + res_ref[...]
    if has_affine:
        y = y * scale_ref[...] + shift_ref[...]
    o_ref[...] = y
    if has_out2:  # decoder head on the already-resident output tile
        o2_ref[...] = jnp.dot(y.astype(BF16), wd_ref[...],
                              preferred_element_type=jnp.float32) + bd_ref[...]


def fused_linear(x1, w1, b, x2=None, w2=None, res=None, scale=None, shift=None,
                 relu=False, w_out2=None, b_out2=None, block_m=BLOCK_M):
    """Row-tiled fused linear.  No wrapper-side pad / cast / concat / slice."""
    M, K1 = x1.shape
    N = w1.shape[1]
    # >= 2 grid steps for moderate M so the 'parallel' row axis feeds both v7x TCs;
    # capped at block_m; always a multiple of 8 (sublane).
    tm = max(8, min(block_m, _ru(pl.cdiv(M, 2), 8)))
    grid = (pl.cdiv(M, tm),)        # ragged last block handled by Pallas

    has_x2 = x2 is not None
    has_res = res is not None
    has_affine = scale is not None
    has_out2 = w_out2 is not None

    operands = [x1, w1]
    in_specs = [pl.BlockSpec((tm, K1), lambda i: (i, 0)),
                pl.BlockSpec((K1, N), lambda i: (0, 0))]
    if has_x2:
        K2 = x2.shape[1]
        operands += [x2, w2]
        in_specs += [pl.BlockSpec((tm, K2), lambda i: (i, 0)),
                     pl.BlockSpec((K2, N), lambda i: (0, 0))]
    operands.append(b)
    in_specs.append(pl.BlockSpec((1, N), lambda i: (0, 0)))
    if has_res:
        operands.append(res)
        in_specs.append(pl.BlockSpec((tm, N), lambda i: (i, 0)))
    if has_affine:
        operands += [scale, shift]
        in_specs += [pl.BlockSpec((1, N), lambda i: (0, 0)),
                     pl.BlockSpec((1, N), lambda i: (0, 0))]
    if has_out2:
        N2 = w_out2.shape[1]
        operands += [w_out2, b_out2]
        in_specs += [pl.BlockSpec((N, N2), lambda i: (0, 0)),
                     pl.BlockSpec((1, N2), lambda i: (0, 0))]

    out_shape = jax.ShapeDtypeStruct((M, N), F32)
    out_specs = pl.BlockSpec((tm, N), lambda i: (i, 0))
    if has_out2:
        out_shape = (out_shape, jax.ShapeDtypeStruct((M, N2), F32))
        out_specs = (out_specs, pl.BlockSpec((tm, N2), lambda i: (i, 0)))

    return pl.pallas_call(
        functools.partial(_fused_kernel, relu, has_x2, has_res, has_affine, has_out2),
        out_shape=out_shape,
        grid=grid,
        in_specs=in_specs,
        out_specs=out_specs,
        compiler_params=pltpu.CompilerParams(
            dimension_semantics=("parallel",),
            vmem_limit_bytes=VMEM_LIMIT),
    )(*operands)


# ----------------------------------------------------------------------------
# Parameters (deterministic init; BN folded, split combine weights, bf16 weights)
# ----------------------------------------------------------------------------
def _dense_init(key, fan_in, fan_out):
    w = jax.random.normal(key, (fan_in, fan_out), F32) / jnp.sqrt(jnp.float32(fan_in))
    b = jnp.zeros((fan_out,), F32)
    return w, b


def _bn_init(d):
    # gamma, beta, running_mean, running_var (PyTorch BatchNorm1d init)
    return (jnp.ones((d,), F32), jnp.zeros((d,), F32),
            jnp.zeros((d,), F32), jnp.ones((d,), F32))


def _bn_fold(bn):
    gamma, beta, mean, var = bn
    scale = gamma * jax.lax.rsqrt(var + BN_EPS)
    shift = beta - mean * scale
    return scale, shift


def init_params(key):
    R, NAB, L = NUM_RELATION, NUM_ANGLE_BIN, NUM_LAYERS
    dims = [INPUT_DIM] + [EMB_DIM] * L
    edge_in_dim = INPUT_DIM * 2 + R + 1 + 1                     # 49
    edge_dims = [edge_in_dim] + dims[:-1]
    keys = iter(jax.random.split(key, 8 * L + 4))
    layers = []
    for i in range(L):
        W_lin, b_lin = _dense_init(next(keys), R * dims[i], dims[i + 1])
        W_self, b_self = _dense_init(next(keys), dims[i], dims[i + 1])
        W_edge, b_edge = _dense_init(next(keys), edge_in_dim, dims[i])
        s, t = _bn_fold(_bn_init(dims[i + 1]))                  # conv-level BN (eval)
        We_lin, be_lin = _dense_init(next(keys), NAB * edge_dims[i], edge_dims[i + 1])
        We_self, be_self = _dense_init(next(keys), edge_dims[i], edge_dims[i + 1])
        se, te = _bn_fold(_bn_init(edge_dims[i + 1]))           # edge-conv BN (eval)
        g_scale, g_shift = _bn_fold(_bn_init(dims[i + 1]))      # GearNet-level BN (eval)
        layers.append({
            # message = layer_input[src] + edge_feature @ W_msg + b_msg
            "W_msg": W_edge.astype(BF16), "b_msg": b_edge.reshape(1, -1),
            # node combine split halves (concat-free): update@W1 + input@W2, BN folded
            "W_node1": (W_lin * s[None, :]).astype(BF16),
            "W_node2": (W_self * s[None, :]).astype(BF16),
            "b_node": ((b_lin + b_self) * s + t).reshape(1, -1),
            # line-graph (edge) combine split halves, BN folded
            "W_edge1": (We_lin * se[None, :]).astype(BF16),
            "W_edge2": (We_self * se[None, :]).astype(BF16),
            "b_edge": ((be_lin + be_self) * se + te).reshape(1, -1),
            # raw conv linear reused on the aggregated edge_hidden path (no BN there)
            "W_nupd": W_lin.astype(BF16), "b_nupd": b_lin.reshape(1, -1),
            # GearNet-level BatchNorm folded into the last fused kernel's output affine
            "gear_scale": g_scale.reshape(1, -1), "gear_shift": g_shift.reshape(1, -1),
        })
    W_dec, b_dec = _dense_init(next(keys), EMB_DIM, N_CLASSES)  # concat_hidden=False
    return {"layers": layers, "W_dec": W_dec.astype(BF16), "b_dec": b_dec.reshape(1, -1)}


# ----------------------------------------------------------------------------
# GraphEncDec forward (GearNet encoder + DenseDecoder)
# ----------------------------------------------------------------------------
def graph_enc_dec_forward(params, x, pos, edge_index, edge_type, batch_idx,
                          n_graphs, max_in_degree):
    R, NAB, L = NUM_RELATION, NUM_ANGLE_BIN, NUM_LAYERS
    N = x.shape[0]
    E = edge_index.shape[1]
    src, dst = edge_index[0], edge_index[1]
    # NOTE: edge_weight is all-ones in the reference module -> multiply elided.

    # --- gear_net_edge_features: [u, v, one_hot(type), |i-j|, dist(pos_u,pos_v)] ---
    et_onehot = jax.nn.one_hot(edge_type, R, dtype=F32)
    diff = pos[src] - pos[dst] + 1e-6                      # torch.pairwise_distance eps
    dists = jnp.sqrt(jnp.sum(diff * diff, axis=-1, keepdims=True))
    seq_dist = jnp.abs(src - dst).astype(F32)[:, None]
    edge_feature = jnp.concatenate([x[src], x[dst], et_onehot, seq_dist, dists], axis=1)
    # loop-invariant bf16 copy: GEMM x-operand of every layer's message linear
    edge_feature_bf = edge_feature.astype(BF16)

    # --- SpatialLineGraph built sparsely: O(E * max_in_degree), not O(E^2) ---
    order = jnp.argsort(dst)
    sorted_dst = dst[order]
    group_start = jnp.searchsorted(sorted_dst, sorted_dst, side="left")
    rank_sorted = (jnp.arange(E) - group_start).astype(jnp.int32)
    rank = jnp.zeros((E,), jnp.int32).at[order].set(rank_sorted)
    # TODO(synk): in-edges beyond `max_in_degree` per node are dropped from the line
    #             graph; callers must pass max_in_degree >= true max in-degree.
    in_table = jnp.full((N, max_in_degree), -1, jnp.int32).at[dst, rank].set(
        jnp.arange(E, dtype=jnp.int32), mode="drop")
    lg_out = jnp.repeat(jnp.arange(E, dtype=jnp.int32), max_in_degree)
    lg_in = in_table[src].reshape(-1)
    lg_valid = lg_in >= 0
    lg_in_safe = jnp.where(lg_valid, lg_in, 0)
    # angle bin relation between edge_in and edge_out (shared node = src[lg_out])
    v1 = pos[dst[lg_out]] - pos[src[lg_out]]
    v2 = pos[src[lg_in_safe]] - pos[src[lg_out]]
    angle = jnp.arctan2(jnp.linalg.norm(jnp.cross(v1, v2), axis=-1),
                        jnp.sum(v1 * v2, axis=-1))
    rel = jnp.clip((angle / jnp.pi * NAB).astype(jnp.int32), 0, NAB - 1)
    # invalid pairs are redirected to a dump segment -> no lg_mask multiply pass
    lg_seg = jnp.where(lg_valid, lg_out * NAB + rel, E * NAB)
    node_seg = dst * R + edge_type                          # relation-major scatter index

    layer_input = x.astype(F32)
    edge_input = edge_feature                               # f32 (segment_sum accum in f32)
    hidden = layer_input
    predictions = None
    for i in range(L):
        p = params["layers"][i]
        d_in = layer_input.shape[1]
        de_in = edge_input.shape[1]
        d_out = p["W_node1"].shape[1]
        last = i == L - 1

        # ---- node conv: fused edge linear + gathered-input residual, scatter, combine ----
        msg = fused_linear(edge_feature_bf, p["W_msg"], p["b_msg"],
                           res=layer_input[src])
        upd = jax.ops.segment_sum(msg, node_seg, num_segments=N * R)
        upd = upd.reshape(N, R * d_in)
        res = layer_input if d_in == d_out else None                  # short_cut
        hidden = fused_linear(upd, p["W_node1"], p["b_node"],
                              x2=layer_input, w2=p["W_node2"], res=res, relu=True)

        # ---- edge message passing on the sparse spatial line graph ----
        eupd = jax.ops.segment_sum(edge_input[lg_in_safe], lg_seg,
                                   num_segments=E * NAB + 1)[:-1]     # drop dump bin
        eupd = eupd.reshape(E, NAB * de_in)
        edge_hidden = fused_linear(eupd, p["W_edge1"], p["b_edge"],
                                   x2=edge_input, w2=p["W_edge2"], relu=True)

        # ---- aggregate edge_hidden to nodes; fused linear+relu+residual+GearNet-BN ----
        nupd = jax.ops.segment_sum(edge_hidden, node_seg, num_segments=N * R)
        nupd = nupd.reshape(N, R * edge_hidden.shape[1])
        out = fused_linear(nupd, p["W_nupd"], p["b_nupd"], res=hidden, relu=True,
                           scale=p["gear_scale"], shift=p["gear_shift"],
                           w_out2=params["W_dec"] if last else None,
                           b_out2=params["b_dec"] if last else None)
        if last:
            hidden, predictions = out      # decoder fused onto the last kernel's tile
        else:
            hidden = out

        edge_input = edge_hidden
        layer_input = hidden

    node_feature = hidden                                    # concat_hidden=False
    graph_embedding = jax.ops.segment_sum(node_feature, batch_idx,
                                          num_segments=n_graphs)   # sum readout
    protein_lengths = jnp.bincount(batch_idx, length=n_graphs)
    return predictions, graph_embedding, protein_lengths


# ----------------------------------------------------------------------------
if __name__ == "__main__":
    key = jax.random.PRNGKey(0)
    kx, kp, kw = jax.random.split(key, 3)

    n_graphs, nodes_per = 2, 8
    N = n_graphs * nodes_per
    x = jax.random.normal(kx, (N, INPUT_DIM), F32)
    pos = jax.random.normal(kp, (N, 3), F32)
    batch_idx = jnp.repeat(jnp.arange(n_graphs, dtype=jnp.int32), nodes_per)

    # bidirectional chain graph within each protein
    srcs, dsts = [], []
    for g in range(n_graphs):
        off = g * nodes_per
        for i in range(nodes_per - 1):
            srcs += [off + i, off + i + 1]
            dsts += [off + i + 1, off + i]
    edge_index = jnp.array([srcs, dsts], dtype=jnp.int32)        # [2, 28]
    edge_type = jnp.zeros((edge_index.shape[1],), jnp.int32)     # single relation

    max_in_degree = int(jnp.max(jnp.bincount(edge_index[1], length=N)))
    params = init_params(kw)

    forward = jax.jit(graph_enc_dec_forward, static_argnums=(6, 7))
    preds, graph_emb, lengths = forward(params, x, pos, edge_index, edge_type,
                                        batch_idx, n_graphs, max_in_degree)
    jax.block_until_ready((preds, graph_emb, lengths))

    assert preds.shape == (N, N_CLASSES)
    assert graph_emb.shape == (n_graphs, EMB_DIM)
    assert lengths.shape == (n_graphs,)
    assert bool(jnp.all(jnp.isfinite(preds)))
    assert bool(jnp.all(jnp.isfinite(graph_emb)))
    print("KERNEL_OK")
</pallas_src>

<mosaic_0001>
module attributes {stable_mosaic.version = 11 : i64} {
  func.func private @main(%arg0: i32) attributes {dimension_semantics = [#tpu.dimension_semantics<core_parallel>], iteration_bounds = array<i64: 2>, tpu.core_type = #tpu.core_type<sc_scalar_subcore>, window_params = []} {
    return
  }
}

module attributes {stable_mosaic.version = 11 : i64} {
  func.func private @main(%arg0: i32) attributes {dimension_semantics = [#tpu.dimension_semantics<core_parallel>], iteration_bounds = array<i64: 2>, tpu.core_type = #tpu.core_type<sc_scalar_subcore>, window_params = []} {
    return
  }
}

module attributes {stable_mosaic.version = 11 : i64} {
  func.func @_fused_kernel(%arg0: i32, %arg1: memref<16x392xf32, #tpu.memory_space<vmem>>, %arg2: memref<392x23xbf16, #tpu.memory_space<vmem>>, %arg3: memref<16x49xf32, #tpu.memory_space<vmem>>, %arg4: memref<49x23xbf16, #tpu.memory_space<vmem>>, %arg5: memref<1x23xf32, #tpu.memory_space<vmem>>, %arg6: memref<16x23xf32, #tpu.memory_space<vmem>>) attributes {dimension_semantics = [#tpu.dimension_semantics<parallel>], iteration_bounds = array<i64: 2>, scalar_prefetch = 0 : i64, scratch_operands = 0 : i64, tpu.core_type = #tpu.core_type<tc>, window_params = [{transform_indices = @transform_0, window_bounds = array<i64: 16, 392>}, {pipeline_mode = #tpu.pipeline_mode<synchronous>, transform_indices = @transform_1, window_bounds = array<i64: 392, 23>}, {transform_indices = @transform_2, window_bounds = array<i64: 16, 49>}, {pipeline_mode = #tpu.pipeline_mode<synchronous>, transform_indices = @transform_3, window_bounds = array<i64: 49, 23>}, {pipeline_mode = #tpu.pipeline_mode<synchronous>, transform_indices = @transform_4, window_bounds = array<i64: 1, 23>}, {transform_indices = @transform_5, window_bounds = array<i64: 16, 23>}]} {
    %c0 = arith.constant 0 : index
    %c0_0 = arith.constant 0 : index
    %0 = vector.load %arg1[%c0, %c0_0] : memref<16x392xf32, #tpu.memory_space<vmem>>, vector<16x392xf32>
    %1 = arith.truncf %0 : vector<16x392xf32> to vector<16x392xbf16>
    %c0_1 = arith.constant 0 : index
    %c0_2 = arith.constant 0 : index
    %2 = vector.load %arg2[%c0_1, %c0_2] : memref<392x23xbf16, #tpu.memory_space<vmem>>, vector<392x23xbf16>
    %cst = arith.constant dense<0.000000e+00> : vector<16x23xf32>
    %3 = tpu.matmul %1, %2, %cst {dimension_numbers = #tpu.dot_dimension_numbers<[1], [0], [0], [1], [0, 0, 1, 1], [], []>} : vector<16x392xbf16>, vector<392x23xbf16>, vector<16x23xf32> -> vector<16x23xf32>
    %c0_3 = arith.constant 0 : index
    %c0_4 = arith.constant 0 : index
    %4 = vector.load %arg3[%c0_3, %c0_4] : memref<16x49xf32, #tpu.memory_space<vmem>>, vector<16x49xf32>
    %5 = arith.truncf %4 : vector<16x49xf32> to vector<16x49xbf16>
    %c0_5 = arith.constant 0 : index
    %c0_6 = arith.constant 0 : index
    %6 = vector.load %arg4[%c0_5, %c0_6] : memref<49x23xbf16, #tpu.memory_space<vmem>>, vector<49x23xbf16>
    %cst_7 = arith.constant dense<0.000000e+00> : vector<16x23xf32>
    %7 = tpu.matmul %5, %6, %cst_7 {dimension_numbers = #tpu.dot_dimension_numbers<[1], [0], [0], [1], [0, 0, 1, 1], [], []>} : vector<16x49xbf16>, vector<49x23xbf16>, vector<16x23xf32> -> vector<16x23xf32>
    %8 = arith.addf %3, %7 : vector<16x23xf32>
    %c0_8 = arith.constant 0 : index
    %c0_9 = arith.constant 0 : index
    %9 = vector.load %arg5[%c0_8, %c0_9] : memref<1x23xf32, #tpu.memory_space<vmem>>, vector<1x23xf32>
    %10 = vector.broadcast %9 : vector<1x23xf32> to vector<16x23xf32>
    %11 = arith.addf %8, %10 : vector<16x23xf32>
    %cst_10 = arith.constant 0.000000e+00 : f32
    %12 = vector.broadcast %cst_10 : f32 to vector<16x23xf32>
    %13 = arith.maximumf %11, %12 : vector<16x23xf32>
    %c0_11 = arith.constant 0 : index
    %c0_12 = arith.constant 0 : index
    %14 = vector.load %arg6[%c0_11, %c0_12] : memref<16x23xf32, #tpu.memory_space<vmem>>, vector<16x23xf32>
    tpu.vector_store %arg6[%c0_11, %c0_12], %13 {strides = array<i32>} : memref<16x23xf32, #tpu.memory_space<vmem>>, vector<16x23xf32>,
    return
  }
  func.func @transform_0(%arg0: i32) -> (i32, i32) {
    %c0_i32 = arith.constant 0 : i32
    %c0_i32_0 = arith.constant 0 : i32
    return %arg0, %c0_i32 : i32, i32
  }
  func.func @transform_1(%arg0: i32) -> (i32, i32) {
    %c0_i32 = arith.constant 0 : i32
    %c0_i32_0 = arith.constant 0 : i32
    %c0_i32_1 = arith.constant 0 : i32
    return %c0_i32, %c0_i32_0 : i32, i32
  }
  func.func @transform_2(%arg0: i32) -> (i32, i32) {
    %c0_i32 = arith.constant 0 : i32
    %c0_i32_0 = arith.constant 0 : i32
    return %arg0, %c0_i32 : i32, i32
  }
  func.func @transform_3(%arg0: i32) -> (i32, i32) {
    %c0_i32 = arith.constant 0 : i32
    %c0_i32_0 = arith.constant 0 : i32
    %c0_i32_1 = arith.constant 0 : i32
    return %c0_i32, %c0_i32_0 : i32, i32
  }
  func.func @transform_4(%arg0: i32) -> (i32, i32) {
    %c0_i32 = arith.constant 0 : i32
    %c0_i32_0 = arith.constant 0 : i32
    %c0_i32_1 = arith.constant 0 : i32
    return %c0_i32, %c0_i32_0 : i32, i32
  }
  func.func @transform_5(%arg0: i32) -> (i32, i32) {
    %c0_i32 = arith.constant 0 : i32
    %c0_i32_0 = arith.constant 0 : i32
    return %arg0, %c0_i32 : i32, i32
  }
}

module attributes {stable_mosaic.version = 11 : i64} {
  func.func @_fused_kernel(%arg0: i32, %arg1: memref<16x184xf32, #tpu.memory_space<vmem>>, %arg2: memref<184x32xbf16, #tpu.memory_space<vmem>>, %arg3: memref<16x23xf32, #tpu.memory_space<vmem>>, %arg4: memref<23x32xbf16, #tpu.memory_space<vmem>>, %arg5: memref<1x32xf32, #tpu.memory_space<vmem>>, %arg6: memref<16x32xf32, #tpu.memory_space<vmem>>) attributes {dimension_semantics = [#tpu.dimension_semantics<parallel>], iteration_bounds = array<i64: 2>, scalar_prefetch = 0 : i64, scratch_operands = 0 : i64, tpu.core_type = #tpu.core_type<tc>, window_params = [{transform_indices = @transform_0, window_bounds = array<i64: 16, 184>}, {pipeline_mode = #tpu.pipeline_mode<synchronous>, transform_indices = @transform_1, window_bounds = array<i64: 184, 32>}, {transform_indices = @transform_2, window_bounds = array<i64: 16, 23>}, {pipeline_mode = #tpu.pipeline_mode<synchronous>, transform_indices = @transform_3, window_bounds = array<i64: 23, 32>}, {pipeline_mode = #tpu.pipeline_mode<synchronous>, transform_indices = @transform_4, window_bounds = array<i64: 1, 32>}, {transform_indices = @transform_5, window_bounds = array<i64: 16, 32>}]} {
    %c0 = arith.constant 0 : index
    %c0_0 = arith.constant 0 : index
    %0 = vector.load %arg1[%c0, %c0_0] : memref<16x184xf32, #tpu.memory_space<vmem>>, vector<16x184xf32>
    %1 = arith.truncf %0 : vector<16x184xf32> to vector<16x184xbf16>
    %c0_1 = arith.constant 0 : index
    %c0_2 = arith.constant 0 : index
    %2 = vector.load %arg2[%c0_1, %c0_2] : memref<184x32xbf16, #tpu.memory_space<vmem>>, vector<184x32xbf16>
    %cst = arith.constant dense<0.000000e+00> : vector<16x32xf32>
    %3 = tpu.matmul %1, %2, %cst {dimension_numbers = #tpu.dot_dimension_numbers<[1], [0], [0], [1], [0, 0, 1, 1], [], []>} : vector<16x184xbf16>, vector<184x32xbf16>, vector<16x32xf32> -> vector<16x32xf32>
    %c0_3 = arith.constant 0 : index
    %c0_4 = arith.constant 0 : index
    %4 = vector.load %arg3[%c0_3, %c0_4] : memref<16x23xf32, #tpu.memory_space<vmem>>, vector<16x23xf32>
    %5 = arith.truncf %4 : vector<16x23xf32> to vector<16x23xbf16>
    %c0_5 = arith.constant 0 : index
    %c0_6 = arith.constant 0 : index
    %6 = vector.load %arg4[%c0_5, %c0_6] : memref<23x32xbf16, #tpu.memory_space<vmem>>, vector<23x32xbf16>
    %cst_7 = arith.constant dense<0.000000e+00> : vector<16x32xf32>
    %7 = tpu.matmul %5, %6, %cst_7 {dimension_numbers = #tpu.dot_dimension_numbers<[1], [0], [0], [1], [0, 0, 1, 1], [], []>} : vector<16x23xbf16>, vector<23x32xbf16>, vector<16x32xf32> -> vector<16x32xf32>
    %8 = arith.addf %3, %7 : vector<16x32xf32>
    %c0_8 = arith.constant 0 : index
    %c0_9 = arith.constant 0 : index
    %9 = vector.load %arg5[%c0_8, %c0_9] : memref<1x32xf32, #tpu.memory_space<vmem>>, vector<1x32xf32>
    %10 = vector.broadcast %9 : vector<1x32xf32> to vector<16x32xf32>
    %11 = arith.addf %8, %10 : vector<16x32xf32>
    %cst_10 = arith.constant 0.000000e+00 : f32
    %12 = vector.broadcast %cst_10 : f32 to vector<16x32xf32>
    %13 = arith.maximumf %11, %12 : vector<16x32xf32>
    %c0_11 = arith.constant 0 : index
    %c0_12 = arith.constant 0 : index
    %14 = vector.load %arg6[%c0_11, %c0_12] : memref<16x32xf32, #tpu.memory_space<vmem>>, vector<16x32xf32>
    tpu.vector_store %arg6[%c0_11, %c0_12], %13 {strides = array<i32>} : memref<16x32xf32, #tpu.memory_space<vmem>>, vector<16x32xf32>,
    return
  }
  func.func @transform_0(%arg0: i32) -> (i32, i32) {
    %c0_i32 = arith.constant 0 : i32
    %c0_i32_0 = arith.constant 0 : i32
    return %arg0, %c0_i32 : i32, i32
  }
  func.func @transform_1(%arg0: i32) -> (i32, i32) {
    %c0_i32 = arith.constant 0 : i32
    %c0_i32_0 = arith.constant 0 : i32
    %c0_i32_1 = arith.constant 0 : i32
    return %c0_i32, %c0_i32_0 : i32, i32
  }
  func.func @transform_2(%arg0: i32) -> (i32, i32) {
    %c0_i32 = arith.constant 0 : i32
    %c0_i32_0 = arith.constant 0 : i32
    return %arg0, %c0_i32 : i32, i32
  }
  func.func @transform_3(%arg0: i32) -> (i32, i32) {
    %c0_i32 = arith.constant 0 : i32
    %c0_i32_0 = arith.constant 0 : i32
    %c0_i32_1 = arith.constant 0 : i32
    return %c0_i32, %c0_i32_0 : i32, i32
  }
  func.func @transform_4(%arg0: i32) -> (i32, i32) {
    %c0_i32 = arith.constant 0 : i32
    %c0_i32_0 = arith.constant 0 : i32
    %c0_i32_1 = arith.constant 0 : i32
    return %c0_i32, %c0_i32_0 : i32, i32
  }
  func.func @transform_5(%arg0: i32) -> (i32, i32) {
    %c0_i32 = arith.constant 0 : i32
    %c0_i32_0 = arith.constant 0 : i32
    return %arg0, %c0_i32 : i32, i32
  }
}

module attributes {stable_mosaic.version = 11 : i64} {
  func.func @_fused_kernel(%arg0: i32, %arg1: memref<16x49xbf16, #tpu.memory_space<vmem>>, %arg2: memref<49x23xbf16, #tpu.memory_space<vmem>>, %arg3: memref<1x23xf32, #tpu.memory_space<vmem>>, %arg4: memref<16x23xf32, #tpu.memory_space<vmem>>, %arg5: memref<16x23xf32, #tpu.memory_space<vmem>>) attributes {dimension_semantics = [#tpu.dimension_semantics<parallel>], iteration_bounds = array<i64: 2>, scalar_prefetch = 0 : i64, scratch_operands = 0 : i64, tpu.core_type = #tpu.core_type<tc>, window_params = [{transform_indices = @transform_0, window_bounds = array<i64: 16, 49>}, {pipeline_mode = #tpu.pipeline_mode<synchronous>, transform_indices = @transform_1, window_bounds = array<i64: 49, 23>}, {pipeline_mode = #tpu.pipeline_mode<synchronous>, transform_indices = @transform_2, window_bounds = array<i64: 1, 23>}, {transform_indices = @transform_3, window_bounds = array<i64: 16, 23>}, {transform_indices = @transform_4, window_bounds = array<i64: 16, 23>}]} {
    %c0 = arith.constant 0 : index
    %c0_0 = arith.constant 0 : index
    %0 = vector.load %arg1[%c0, %c0_0] : memref<16x49xbf16, #tpu.memory_space<vmem>>, vector<16x49xbf16>
    %c0_1 = arith.constant 0 : index
    %c0_2 = arith.constant 0 : index
    %1 = vector.load %arg2[%c0_1, %c0_2] : memref<49x23xbf16, #tpu.memory_space<vmem>>, vector<49x23xbf16>
    %cst = arith.constant dense<0.000000e+00> : vector<16x23xf32>
    %2 = tpu.matmul %0, %1, %cst {dimension_numbers = #tpu.dot_dimension_numbers<[1], [0], [0], [1], [0, 0, 1, 1], [], []>} : vector<16x49xbf16>, vector<49x23xbf16>, vector<16x23xf32> -> vector<16x23xf32>
    %c0_3 = arith.constant 0 : index
    %c0_4 = arith.constant 0 : index
    %3 = vector.load %arg3[%c0_3, %c0_4] : memref<1x23xf32, #tpu.memory_space<vmem>>, vector<1x23xf32>
    %4 = vector.broadcast %3 : vector<1x23xf32> to vector<16x23xf32>
    %5 = arith.addf %2, %4 : vector<16x23xf32>
    %c0_5 = arith.constant 0 : index
    %c0_6 = arith.constant 0 : index
    %6 = vector.load %arg4[%c0_5, %c0_6] : memref<16x23xf32, #tpu.memory_space<vmem>>, vector<16x23xf32>
    %7 = arith.addf %5, %6 : vector<16x23xf32>
    %c0_7 = arith.constant 0 : index
    %c0_8 = arith.constant 0 : index
    %8 = vector.load %arg5[%c0_7, %c0_8] : memref<16x23xf32, #tpu.memory_space<vmem>>, vector<16x23xf32>
    tpu.vector_store %arg5[%c0_7, %c0_8], %7 {strides = array<i32>} : memref<16x23xf32, #tpu.memory_space<vmem>>, vector<16x23xf32>,
    return
  }
  func.func @transform_0(%arg0: i32) -> (i32, i32) {
    %c0_i32 = arith.constant 0 : i32
    %c0_i32_0 = arith.constant 0 : i32
    return %arg0, %c0_i32 : i32, i32
  }
  func.func @transform_1(%arg0: i32) -> (i32, i32) {
    %c0_i32 = arith.constant 0 : i32
    %c0_i32_0 = arith.constant 0 : i32
    %c0_i32_1 = arith.constant 0 : i32
    return %c0_i32, %c0_i32_0 : i32, i32
  }
  func.func @transform_2(%arg0: i32) -> (i32, i32) {
    %c0_i32 = arith.constant 0 : i32
    %c0_i32_0 = arith.constant 0 : i32
    %c0_i32_1 = arith.constant 0 : i32
    return %c0_i32, %c0_i32_0 : i32, i32
  }
  func.func @transform_3(%arg0: i32) -> (i32, i32) {
    %c0_i32 = arith.constant 0 : i32
    %c0_i32_0 = arith.constant 0 : i32
    return %arg0, %c0_i32 : i32, i32
  }
  func.func @transform_4(%arg0: i32) -> (i32, i32) {
    %c0_i32 = arith.constant 0 : i32
    %c0_i32_0 = arith.constant 0 : i32
    return %arg0, %c0_i32 : i32, i32
  }
}

module attributes {stable_mosaic.version = 11 : i64} {
  func.func @_fused_kernel(%arg0: i32, %arg1: memref<16x256xf32, #tpu.memory_space<vmem>>, %arg2: memref<256x32xbf16, #tpu.memory_space<vmem>>, %arg3: memref<16x32xf32, #tpu.memory_space<vmem>>, %arg4: memref<32x32xbf16, #tpu.memory_space<vmem>>, %arg5: memref<1x32xf32, #tpu.memory_space<vmem>>, %arg6: memref<16x32xf32, #tpu.memory_space<vmem>>) attributes {dimension_semantics = [#tpu.dimension_semantics<parallel>], iteration_bounds = array<i64: 2>, scalar_prefetch = 0 : i64, scratch_operands = 0 : i64, tpu.core_type = #tpu.core_type<tc>, window_params = [{transform_indices = @transform_0, window_bounds = array<i64: 16, 256>}, {pipeline_mode = #tpu.pipeline_mode<synchronous>, transform_indices = @transform_1, window_bounds = array<i64: 256, 32>}, {transform_indices = @transform_2, window_bounds = array<i64: 16, 32>}, {pipeline_mode = #tpu.pipeline_mode<synchronous>, transform_indices = @transform_3, window_bounds = array<i64: 32, 32>}, {pipeline_mode = #tpu.pipeline_mode<synchronous>, transform_indices = @transform_4, window_bounds = array<i64: 1, 32>}, {transform_indices = @transform_5, window_bounds = array<i64: 16, 32>}]} {
    %c0 = arith.constant 0 : index
    %c0_0 = arith.constant 0 : index
    %0 = vector.load %arg1[%c0, %c0_0] : memref<16x256xf32, #tpu.memory_space<vmem>>, vector<16x256xf32>
    %1 = arith.truncf %0 : vector<16x256xf32> to vector<16x256xbf16>
    %c0_1 = arith.constant 0 : index
    %c0_2 = arith.constant 0 : index
    %2 = vector.load %arg2[%c0_1, %c0_2] : memref<256x32xbf16, #tpu.memory_space<vmem>>, vector<256x32xbf16>
    %cst = arith.constant dense<0.000000e+00> : vector<16x32xf32>
    %3 = tpu.matmul %1, %2, %cst {dimension_numbers = #tpu.dot_dimension_numbers<[1], [0], [0], [1], [0, 0, 1, 1], [], []>} : vector<16x256xbf16>, vector<256x32xbf16>, vector<16x32xf32> -> vector<16x32xf32>
    %c0_3 = arith.constant 0 : index
    %c0_4 = arith.constant 0 : index
    %4 = vector.load %arg3[%c0_3, %c0_4] : memref<16x32xf32, #tpu.memory_space<vmem>>, vector<16x32xf32>
    %5 = arith.truncf %4 : vector<16x32xf32> to vector<16x32xbf16>
    %c0_5 = arith.constant 0 : index
    %c0_6 = arith.constant 0 : index
    %6 = vector.load %arg4[%c0_5, %c0_6] : memref<32x32xbf16, #tpu.memory_space<vmem>>, vector<32x32xbf16>
    %cst_7 = arith.constant dense<0.000000e+00> : vector<16x32xf32>
    %7 = tpu.matmul %5, %6, %cst_7 {dimension_numbers = #tpu.dot_dimension_numbers<[1], [0], [0], [1], [0, 0, 1, 1], [], []>} : vector<16x32xbf16>, vector<32x32xbf16>, vector<16x32xf32> -> vector<16x32xf32>
    %8 = arith.addf %3, %7 : vector<16x32xf32>
    %c0_8 = arith.constant 0 : index
    %c0_9 = arith.constant 0 : index
    %9 = vector.load %arg5[%c0_8, %c0_9] : memref<1x32xf32, #tpu.memory_space<vmem>>, vector<1x32xf32>
    %10 = vector.broadcast %9 : vector<1x32xf32> to vector<16x32xf32>
    %11 = arith.addf %8, %10 : vector<16x32xf32>
    %cst_10 = arith.constant 0.000000e+00 : f32
    %12 = vector.broadcast %cst_10 : f32 to vector<16x32xf32>
    %13 = arith.maximumf %11, %12 : vector<16x32xf32>
    %c0_11 = arith.constant 0 : index
    %c0_12 = arith.constant 0 : index
    %14 = vector.load %arg6[%c0_11, %c0_12] : memref<16x32xf32, #tpu.memory_space<vmem>>, vector<16x32xf32>
    tpu.vector_store %arg6[%c0_11, %c0_12], %13 {strides = array<i32>} : memref<16x32xf32, #tpu.memory_space<vmem>>, vector<16x32xf32>,
    return
  }
  func.func @transform_0(%arg0: i32) -> (i32, i32) {
    %c0_i32 = arith.constant 0 : i32
    %c0_i32_0 = arith.constant 0 : i32
    return %arg0, %c0_i32 : i32, i32
  }
  func.func @transform_1(%arg0: i32) -> (i32, i32) {
    %c0_i32 = arith.constant 0 : i32
    %c0_i32_0 = arith.constant 0 : i32
    %c0_i32_1 = arith.constant 0 : i32
    return %c0_i32, %c0_i32_0 : i32, i32
  }
  func.func @transform_2(%arg0: i32) -> (i32, i32) {
    %c0_i32 = arith.constant 0 : i32
    %c0_i32_0 = arith.constant 0 : i32
    return %arg0, %c0_i32 : i32, i32
  }
  func.func @transform_3(%arg0: i32) -> (i32, i32) {
    %c0_i32 = arith.constant 0 : i32
    %c0_i32_0 = arith.constant 0 : i32
    %c0_i32_1 = arith.constant 0 : i32
    return %c0_i32, %c0_i32_0 : i32, i32
  }
  func.func @transform_4(%arg0: i32) -> (i32, i32) {
    %c0_i32 = arith.constant 0 : i32
    %c0_i32_0 = arith.constant 0 : i32
    %c0_i32_1 = arith.constant 0 : i32
    return %c0_i32, %c0_i32_0 : i32, i32
  }
  func.func @transform_5(%arg0: i32) -> (i32, i32) {
    %c0_i32 = arith.constant 0 : i32
    %c0_i32_0 = arith.constant 0 : i32
    return %arg0, %c0_i32 : i32, i32
  }
}

module attributes {stable_mosaic.version = 11 : i64} {
  func.func @_fused_kernel(%arg0: i32, %arg1: memref<8x23xf32, #tpu.memory_space<vmem>>, %arg2: memref<23x32xbf16, #tpu.memory_space<vmem>>, %arg3: memref<8x23xf32, #tpu.memory_space<vmem>>, %arg4: memref<23x32xbf16, #tpu.memory_space<vmem>>, %arg5: memref<1x32xf32, #tpu.memory_space<vmem>>, %arg6: memref<8x32xf32, #tpu.memory_space<vmem>>) attributes {dimension_semantics = [#tpu.dimension_semantics<parallel>], iteration_bounds = array<i64: 2>, scalar_prefetch = 0 : i64, scratch_operands = 0 : i64, tpu.core_type = #tpu.core_type<tc>, window_params = [{transform_indices = @transform_0, window_bounds = array<i64: 8, 23>}, {pipeline_mode = #tpu.pipeline_mode<synchronous>, transform_indices = @transform_1, window_bounds = array<i64: 23, 32>}, {transform_indices = @transform_2, window_bounds = array<i64: 8, 23>}, {pipeline_mode = #tpu.pipeline_mode<synchronous>, transform_indices = @transform_3, window_bounds = array<i64: 23, 32>}, {pipeline_mode = #tpu.pipeline_mode<synchronous>, transform_indices = @transform_4, window_bounds = array<i64: 1, 32>}, {transform_indices = @transform_5, window_bounds = array<i64: 8, 32>}]} {
    %c0 = arith.constant 0 : index
    %c0_0 = arith.constant 0 : index
    %0 = vector.load %arg1[%c0, %c0_0] : memref<8x23xf32, #tpu.memory_space<vmem>>, vector<8x23xf32>
    %1 = arith.truncf %0 : vector<8x23xf32> to vector<8x23xbf16>
    %c0_1 = arith.constant 0 : index
    %c0_2 = arith.constant 0 : index
    %2 = vector.load %arg2[%c0_1, %c0_2] : memref<23x32xbf16, #tpu.memory_space<vmem>>, vector<23x32xbf16>
    %cst = arith.constant dense<0.000000e+00> : vector<8x32xf32>
    %3 = tpu.matmul %1, %2, %cst {dimension_numbers = #tpu.dot_dimension_numbers<[1], [0], [0], [1], [0, 0, 1, 1], [], []>} : vector<8x23xbf16>, vector<23x32xbf16>, vector<8x32xf32> -> vector<8x32xf32>
    %c0_3 = arith.constant 0 : index
    %c0_4 = arith.constant 0 : index
    %4 = vector.load %arg3[%c0_3, %c0_4] : memref<8x23xf32, #tpu.memory_space<vmem>>, vector<8x23xf32>
    %5 = arith.truncf %4 : vector<8x23xf32> to vector<8x23xbf16>
    %c0_5 = arith.constant 0 : index
    %c0_6 = arith.constant 0 : index
    %6 = vector.load %arg4[%c0_5, %c0_6] : memref<23x32xbf16, #tpu.memory_space<vmem>>, vector<23x32xbf16>
    %cst_7 = arith.constant dense<0.000000e+00> : vector<8x32xf32>
    %7 = tpu.matmul %5, %6, %cst_7 {dimension_numbers = #tpu.dot_dimension_numbers<[1], [0], [0], [1], [0, 0, 1, 1], [], []>} : vector<8x23xbf16>, vector<23x32xbf16>, vector<8x32xf32> -> vector<8x32xf32>
    %8 = arith.addf %3, %7 : vector<8x32xf32>
    %c0_8 = arith.constant 0 : index
    %c0_9 = arith.constant 0 : index
    %9 = vector.load %arg5[%c0_8, %c0_9] : memref<1x32xf32, #tpu.memory_space<vmem>>, vector<1x32xf32>
    %10 = vector.broadcast %9 : vector<1x32xf32> to vector<8x32xf32>
    %11 = arith.addf %8, %10 : vector<8x32xf32>
    %cst_10 = arith.constant 0.000000e+00 : f32
    %12 = vector.broadcast %cst_10 : f32 to vector<8x32xf32>
    %13 = arith.maximumf %11, %12 : vector<8x32xf32>
    %c0_11 = arith.constant 0 : index
    %c0_12 = arith.constant 0 : index
    %14 = vector.load %arg6[%c0_11, %c0_12] : memref<8x32xf32, #tpu.memory_space<vmem>>, vector<8x32xf32>
    tpu.vector_store %arg6[%c0_11, %c0_12], %13 {strides = array<i32>} : memref<8x32xf32, #tpu.memory_space<vmem>>, vector<8x32xf32>,
    return
  }
  func.func @transform_0(%arg0: i32) -> (i32, i32) {
    %c0_i32 = arith.constant 0 : i32
    %c0_i32_0 = arith.constant 0 : i32
    return %arg0, %c0_i32 : i32, i32
  }
  func.func @transform_1(%arg0: i32) -> (i32, i32) {
    %c0_i32 = arith.constant 0 : i32
    %c0_i32_0 = arith.constant 0 : i32
    %c0_i32_1 = arith.constant 0 : i32
    return %c0_i32, %c0_i32_0 : i32, i32
  }
  func.func @transform_2(%arg0: i32) -> (i32, i32) {
    %c0_i32 = arith.constant 0 : i32
    %c0_i32_0 = arith.constant 0 : i32
    return %arg0, %c0_i32 : i32, i32
  }
  func.func @transform_3(%arg0: i32) -> (i32, i32) {
    %c0_i32 = arith.constant 0 : i32
    %c0_i32_0 = arith.constant 0 : i32
    %c0_i32_1 = arith.constant 0 : i32
    return %c0_i32, %c0_i32_0 : i32, i32
  }
  func.func @transform_4(%arg0: i32) -> (i32, i32) {
    %c0_i32 = arith.constant 0 : i32
    %c0_i32_0 = arith.constant 0 : i32
    %c0_i32_1 = arith.constant 0 : i32
    return %c0_i32, %c0_i32_0 : i32, i32
  }
  func.func @transform_5(%arg0: i32) -> (i32, i32) {
    %c0_i32 = arith.constant 0 : i32
    %c0_i32_0 = arith.constant 0 : i32
    return %arg0, %c0_i32 : i32, i32
  }
}

module attributes {stable_mosaic.version = 11 : i64} {
  func.func @_fused_kernel(%arg0: i32, %arg1: memref<8x23xf32, #tpu.memory_space<vmem>>, %arg2: memref<23x32xbf16, #tpu.memory_space<vmem>>, %arg3: memref<1x32xf32, #tpu.memory_space<vmem>>, %arg4: memref<8x32xf32, #tpu.memory_space<vmem>>, %arg5: memref<1x32xf32, #tpu.memory_space<vmem>>, %arg6: memref<1x32xf32, #tpu.memory_space<vmem>>, %arg7: memref<8x32xf32, #tpu.memory_space<vmem>>) attributes {dimension_semantics = [#tpu.dimension_semantics<parallel>], iteration_bounds = array<i64: 2>, scalar_prefetch = 0 : i64, scratch_operands = 0 : i64, tpu.core_type = #tpu.core_type<tc>, window_params = [{transform_indices = @transform_0, window_bounds = array<i64: 8, 23>}, {pipeline_mode = #tpu.pipeline_mode<synchronous>, transform_indices = @transform_1, window_bounds = array<i64: 23, 32>}, {pipeline_mode = #tpu.pipeline_mode<synchronous>, transform_indices = @transform_2, window_bounds = array<i64: 1, 32>}, {transform_indices = @transform_3, window_bounds = array<i64: 8, 32>}, {pipeline_mode = #tpu.pipeline_mode<synchronous>, transform_indices = @transform_4, window_bounds = array<i64: 1, 32>}, {pipeline_mode = #tpu.pipeline_mode<synchronous>, transform_indices = @transform_5, window_bounds = array<i64: 1, 32>}, {transform_indices = @transform_6, window_bounds = array<i64: 8, 32>}]} {
    %c0 = arith.constant 0 : index
    %c0_0 = arith.constant 0 : index
    %0 = vector.load %arg1[%c0, %c0_0] : memref<8x23xf32, #tpu.memory_space<vmem>>, vector<8x23xf32>
    %1 = arith.truncf %0 : vector<8x23xf32> to vector<8x23xbf16>
    %c0_1 = arith.constant 0 : index
    %c0_2 = arith.constant 0 : index
    %2 = vector.load %arg2[%c0_1, %c0_2] : memref<23x32xbf16, #tpu.memory_space<vmem>>, vector<23x32xbf16>
    %cst = arith.constant dense<0.000000e+00> : vector<8x32xf32>
    %3 = tpu.matmul %1, %2, %cst {dimension_numbers = #tpu.dot_dimension_numbers<[1], [0], [0], [1], [0, 0, 1, 1], [], []>} : vector<8x23xbf16>, vector<23x32xbf16>, vector<8x32xf32> -> vector<8x32xf32>
    %c0_3 = arith.constant 0 : index
    %c0_4 = arith.constant 0 : index
    %4 = vector.load %arg3[%c0_3, %c0_4] : memref<1x32xf32, #tpu.memory_space<vmem>>, vector<1x32xf32>
    %5 = vector.broadcast %4 : vector<1x32xf32> to vector<8x32xf32>
    %6 = arith.addf %3, %5 : vector<8x32xf32>
    %cst_5 = arith.constant 0.000000e+00 : f32
    %7 = vector.broadcast %cst_5 : f32 to vector<8x32xf32>
    %8 = arith.maximumf %6, %7 : vector<8x32xf32>
    %c0_6 = arith.constant 0 : index
    %c0_7 = arith.constant 0 : index
    %9 = vector.load %arg4[%c0_6, %c0_7] : memref<8x32xf32, #tpu.memory_space<vmem>>, vector<8x32xf32>
    %10 = arith.addf %8, %9 : vector<8x32xf32>
    %c0_8 = arith.constant 0 : index
    %c0_9 = arith.constant 0 : index
    %11 = vector.load %arg5[%c0_8, %c0_9] : memref<1x32xf32, #tpu.memory_space<vmem>>, vector<1x32xf32>
    %12 = vector.broadcast %11 : vector<1x32xf32> to vector<8x32xf32>
    %13 = arith.mulf %10, %12 : vector<8x32xf32>
    %c0_10 = arith.constant 0 : index
    %c0_11 = arith.constant 0 : index
    %14 = vector.load %arg6[%c0_10, %c0_11] : memref<1x32xf32, #tpu.memory_space<vmem>>, vector<1x32xf32>
    %15 = vector.broadcast %14 : vector<1x32xf32> to vector<8x32xf32>
    %16 = arith.addf %13, %15 : vector<8x32xf32>
    %c0_12 = arith.constant 0 : index
    %c0_13 = arith.constant 0 : index
    %17 = vector.load %arg7[%c0_12, %c0_13] : memref<8x32xf32, #tpu.memory_space<vmem>>, vector<8x32xf32>
    tpu.vector_store %arg7[%c0_12, %c0_13], %16 {strides = array<i32>} : memref<8x32xf32, #tpu.memory_space<vmem>>, vector<8x32xf32>,
    return
  }
  func.func @transform_0(%arg0: i32) -> (i32, i32) {
    %c0_i32 = arith.constant 0 : i32
    %c0_i32_0 = arith.constant 0 : i32
    return %arg0, %c0_i32 : i32, i32
  }
  func.func @transform_1(%arg0: i32) -> (i32, i32) {
    %c0_i32 = arith.constant 0 : i32
    %c0_i32_0 = arith.constant 0 : i32
    %c0_i32_1 = arith.constant 0 : i32
    return %c0_i32, %c0_i32_0 : i32, i32
  }
  func.func @transform_2(%arg0: i32) -> (i32, i32) {
    %c0_i32 = arith.constant 0 : i32
    %c0_i32_0 = arith.constant 0 : i32
    %c0_i32_1 = arith.constant 0 : i32
    return %c0_i32, %c0_i32_0 : i32, i32
  }
  func.func @transform_3(%arg0: i32) -> (i32, i32) {
    %c0_i32 = arith.constant 0 : i32
    %c0_i32_0 = arith.constant 0 : i32
    return %arg0, %c0_i32 : i32, i32
  }
  func.func @transform_4(%arg0: i32) -> (i32, i32) {
    %c0_i32 = arith.constant 0 : i32
    %c0_i32_0 = arith.constant 0 : i32
    %c0_i32_1 = arith.constant 0 : i32
    return %c0_i32, %c0_i32_0 : i32, i32
  }
  func.func @transform_5(%arg0: i32) -> (i32, i32) {
    %c0_i32 = arith.constant 0 : i32
    %c0_i32_0 = arith.constant 0 : i32
    %c0_i32_1 = arith.constant 0 : i32
    return %c0_i32, %c0_i32_0 : i32, i32
  }
  func.func @transform_6(%arg0: i32) -> (i32, i32) {
    %c0_i32 = arith.constant 0 : i32
    %c0_i32_0 = arith.constant 0 : i32
    return %arg0, %c0_i32 : i32, i32
  }
}

module attributes {stable_mosaic.version = 11 : i64} {
  func.func @_fused_kernel(%arg0: i32, %arg1: memref<8x32xf32, #tpu.memory_space<vmem>>, %arg2: memref<32x32xbf16, #tpu.memory_space<vmem>>, %arg3: memref<1x32xf32, #tpu.memory_space<vmem>>, %arg4: memref<8x32xf32, #tpu.memory_space<vmem>>, %arg5: memref<1x32xf32, #tpu.memory_space<vmem>>, %arg6: memref<1x32xf32, #tpu.memory_space<vmem>>, %arg7: memref<8x32xf32, #tpu.memory_space<vmem>>) attributes {dimension_semantics = [#tpu.dimension_semantics<parallel>], iteration_bounds = array<i64: 2>, scalar_prefetch = 0 : i64, scratch_operands = 0 : i64, tpu.core_type = #tpu.core_type<tc>, window_params = [{transform_indices = @transform_0, window_bounds = array<i64: 8, 32>}, {pipeline_mode = #tpu.pipeline_mode<synchronous>, transform_indices = @transform_1, window_bounds = array<i64: 32, 32>}, {pipeline_mode = #tpu.pipeline_mode<synchronous>, transform_indices = @transform_2, window_bounds = array<i64: 1, 32>}, {transform_indices = @transform_3, window_bounds = array<i64: 8, 32>}, {pipeline_mode = #tpu.pipeline_mode<synchronous>, transform_indices = @transform_4, window_bounds = array<i64: 1, 32>}, {pipeline_mode = #tpu.pipeline_mode<synchronous>, transform_indices = @transform_5, window_bounds = array<i64: 1, 32>}, {transform_indices = @transform_6, window_bounds = array<i64: 8, 32>}]} {
    %c0 = arith.constant 0 : index
    %c0_0 = arith.constant 0 : index
    %0 = vector.load %arg1[%c0, %c0_0] : memref<8x32xf32, #tpu.memory_space<vmem>>, vector<8x32xf32>
    %1 = arith.truncf %0 : vector<8x32xf32> to vector<8x32xbf16>
    %c0_1 = arith.constant 0 : index
    %c0_2 = arith.constant 0 : index
    %2 = vector.load %arg2[%c0_1, %c0_2] : memref<32x32xbf16, #tpu.memory_space<vmem>>, vector<32x32xbf16>
    %cst = arith.constant dense<0.000000e+00> : vector<8x32xf32>
    %3 = tpu.matmul %1, %2, %cst {dimension_numbers = #tpu.dot_dimension_numbers<[1], [0], [0], [1], [0, 0, 1, 1], [], []>} : vector<8x32xbf16>, vector<32x32xbf16>, vector<8x32xf32> -> vector<8x32xf32>
    %c0_3 = arith.constant 0 : index
    %c0_4 = arith.constant 0 : index
    %4 = vector.load %arg3[%c0_3, %c0_4] : memref<1x32xf32, #tpu.memory_space<vmem>>, vector<1x32xf32>
    %5 = vector.broadcast %4 : vector<1x32xf32> to vector<8x32xf32>
    %6 = arith.addf %3, %5 : vector<8x32xf32>
    %cst_5 = arith.constant 0.000000e+00 : f32
    %7 = vector.broadcast %cst_5 : f32 to vector<8x32xf32>
    %8 = arith.maximumf %6, %7 : vector<8x32xf32>
    %c0_6 = arith.constant 0 : index
    %c0_7 = arith.constant 0 : index
    %9 = vector.load %arg4[%c0_6, %c0_7] : memref<8x32xf32, #tpu.memory_space<vmem>>, vector<8x32xf32>
    %10 = arith.addf %8, %9 : vector<8x32xf32>
    %c0_8 = arith.constant 0 : index
    %c0_9 = arith.constant 0 : index
    %11 = vector.load %arg5[%c0_8, %c0_9] : memref<1x32xf32, #tpu.memory_space<vmem>>, vector<1x32xf32>
    %12 = vector.broadcast %11 : vector<1x32xf32> to vector<8x32xf32>
    %13 = arith.mulf %10, %12 : vector<8x32xf32>
    %c0_10 = arith.constant 0 : index
    %c0_11 = arith.constant 0 : index
    %14 = vector.load %arg6[%c0_10, %c0_11] : memref<1x32xf32, #tpu.memory_space<vmem>>, vector<1x32xf32>
    %15 = vector.broadcast %14 : vector<1x32xf32> to vector<8x32xf32>
    %16 = arith.addf %13, %15 : vector<8x32xf32>
    %c0_12 = arith.constant 0 : index
    %c0_13 = arith.constant 0 : index
    %17 = vector.load %arg7[%c0_12, %c0_13] : memref<8x32xf32, #tpu.memory_space<vmem>>, vector<8x32xf32>
    tpu.vector_store %arg7[%c0_12, %c0_13], %16 {strides = array<i32>} : memref<8x32xf32, #tpu.memory_space<vmem>>, vector<8x32xf32>,
    return
  }
  func.func @transform_0(%arg0: i32) -> (i32, i32) {
    %c0_i32 = arith.constant 0 : i32
    %c0_i32_0 = arith.constant 0 : i32
    return %arg0, %c0_i32 : i32, i32
  }
  func.func @transform_1(%arg0: i32) -> (i32, i32) {
    %c0_i32 = arith.constant 0 : i32
    %c0_i32_0 = arith.constant 0 : i32
    %c0_i32_1 = arith.constant 0 : i32
    return %c0_i32, %c0_i32_0 : i32, i32
  }
  func.func @transform_2(%arg0: i32) -> (i32, i32) {
    %c0_i32 = arith.constant 0 : i32
    %c0_i32_0 = arith.constant 0 : i32
    %c0_i32_1 = arith.constant 0 : i32
    return %c0_i32, %c0_i32_0 : i32, i32
  }
  func.func @transform_3(%arg0: i32) -> (i32, i32) {
    %c0_i32 = arith.constant 0 : i32
    %c0_i32_0 = arith.constant 0 : i32
    return %arg0, %c0_i32 : i32, i32
  }
  func.func @transform_4(%arg0: i32) -> (i32, i32) {
    %c0_i32 = arith.constant 0 : i32
    %c0_i32_0 = arith.constant 0 : i32
    %c0_i32_1 = arith.constant 0 : i32
    return %c0_i32, %c0_i32_0 : i32, i32
  }
  func.func @transform_5(%arg0: i32) -> (i32, i32) {
    %c0_i32 = arith.constant 0 : i32
    %c0_i32_0 = arith.constant 0 : i32
    %c0_i32_1 = arith.constant 0 : i32
    return %c0_i32, %c0_i32_0 : i32, i32
  }
  func.func @transform_6(%arg0: i32) -> (i32, i32) {
    %c0_i32 = arith.constant 0 : i32
    %c0_i32_0 = arith.constant 0 : i32
    return %arg0, %c0_i32 : i32, i32
  }
}

module attributes {stable_mosaic.version = 11 : i64} {
  func.func @_fused_kernel(%arg0: i32, %arg1: memref<8x32xf32, #tpu.memory_space<vmem>>, %arg2: memref<32x32xbf16, #tpu.memory_space<vmem>>, %arg3: memref<8x32xf32, #tpu.memory_space<vmem>>, %arg4: memref<32x32xbf16, #tpu.memory_space<vmem>>, %arg5: memref<1x32xf32, #tpu.memory_space<vmem>>, %arg6: memref<8x32xf32, #tpu.memory_space<vmem>>, %arg7: memref<8x32xf32, #tpu.memory_space<vmem>>) attributes {dimension_semantics = [#tpu.dimension_semantics<parallel>], iteration_bounds = array<i64: 2>, scalar_prefetch = 0 : i64, scratch_operands = 0 : i64, tpu.core_type = #tpu.core_type<tc>, window_params = [{transform_indices = @transform_0, window_bounds = array<i64: 8, 32>}, {pipeline_mode = #tpu.pipeline_mode<synchronous>, transform_indices = @transform_1, window_bounds = array<i64: 32, 32>}, {transform_indices = @transform_2, window_bounds = array<i64: 8, 32>}, {pipeline_mode = #tpu.pipeline_mode<synchronous>, transform_indices = @transform_3, window_bounds = array<i64: 32, 32>}, {pipeline_mode = #tpu.pipeline_mode<synchronous>, transform_indices = @transform_4, window_bounds = array<i64: 1, 32>}, {transform_indices = @transform_5, window_bounds = array<i64: 8, 32>}, {transform_indices = @transform_6, window_bounds = array<i64: 8, 32>}]} {
    %c0 = arith.constant 0 : index
    %c0_0 = arith.constant 0 : index
    %0 = vector.load %arg1[%c0, %c0_0] : memref<8x32xf32, #tpu.memory_space<vmem>>, vector<8x32xf32>
    %1 = arith.truncf %0 : vector<8x32xf32> to vector<8x32xbf16>
    %c0_1 = arith.constant 0 : index
    %c0_2 = arith.constant 0 : index
    %2 = vector.load %arg2[%c0_1, %c0_2] : memref<32x32xbf16, #tpu.memory_space<vmem>>, vector<32x32xbf16>
    %cst = arith.constant dense<0.000000e+00> : vector<8x32xf32>
    %3 = tpu.matmul %1, %2, %cst {dimension_numbers = #tpu.dot_dimension_numbers<[1], [0], [0], [1], [0, 0, 1, 1], [], []>} : vector<8x32xbf16>, vector<32x32xbf16>, vector<8x32xf32> -> vector<8x32xf32>
    %c0_3 = arith.constant 0 : index
    %c0_4 = arith.constant 0 : index
    %4 = vector.load %arg3[%c0_3, %c0_4] : memref<8x32xf32, #tpu.memory_space<vmem>>, vector<8x32xf32>
    %5 = arith.truncf %4 : vector<8x32xf32> to vector<8x32xbf16>
    %c0_5 = arith.constant 0 : index
    %c0_6 = arith.constant 0 : index
    %6 = vector.load %arg4[%c0_5, %c0_6] : memref<32x32xbf16, #tpu.memory_space<vmem>>, vector<32x32xbf16>
    %cst_7 = arith.constant dense<0.000000e+00> : vector<8x32xf32>
    %7 = tpu.matmul %5, %6, %cst_7 {dimension_numbers = #tpu.dot_dimension_numbers<[1], [0], [0], [1], [0, 0, 1, 1], [], []>} : vector<8x32xbf16>, vector<32x32xbf16>, vector<8x32xf32> -> vector<8x32xf32>
    %8 = arith.addf %3, %7 : vector<8x32xf32>
    %c0_8 = arith.constant 0 : index
    %c0_9 = arith.constant 0 : index
    %9 = vector.load %arg5[%c0_8, %c0_9] : memref<1x32xf32, #tpu.memory_space<vmem>>, vector<1x32xf32>
    %10 = vector.broadcast %9 : vector<1x32xf32> to vector<8x32xf32>
    %11 = arith.addf %8, %10 : vector<8x32xf32>
    %cst_10 = arith.constant 0.000000e+00 : f32
    %12 = vector.broadcast %cst_10 : f32 to vector<8x32xf32>
    %13 = arith.maximumf %11, %12 : vector<8x32xf32>
    %c0_11 = arith.constant 0 : index
    %c0_12 = arith.constant 0 : index
    %14 = vector.load %arg6[%c0_11, %c0_12] : memref<8x32xf32, #tpu.memory_space<vmem>>, vector<8x32xf32>
    %15 = arith.addf %13, %14 : vector<8x32xf32>
    %c0_13 = arith.constant 0 : index
    %c0_14 = arith.constant 0 : index
    %16 = vector.load %arg7[%c0_13, %c0_14] : memref<8x32xf32, #tpu.memory_space<vmem>>, vector<8x32xf32>
    tpu.vector_store %arg7[%c0_13, %c0_14], %15 {strides = array<i32>} : memref<8x32xf32, #tpu.memory_space<vmem>>, vector<8x32xf32>,
    return
  }
  func.func @transform_0(%arg0: i32) -> (i32, i32) {
    %c0_i32 = arith.constant 0 : i32
    %c0_i32_0 = arith.constant 0 : i32
    return %arg0, %c0_i32 : i32, i32
  }
  func.func @transform_1(%arg0: i32) -> (i32, i32) {
    %c0_i32 = arith.constant 0 : i32
    %c0_i32_0 = arith.constant 0 : i32
    %c0_i32_1 = arith.constant 0 : i32
    return %c0_i32, %c0_i32_0 : i32, i32
  }
  func.func @transform_2(%arg0: i32) -> (i32, i32) {
    %c0_i32 = arith.constant 0 : i32
    %c0_i32_0 = arith.constant 0 : i32
    return %arg0, %c0_i32 : i32, i32
  }
  func.func @transform_3(%arg0: i32) -> (i32, i32) {
    %c0_i32 = arith.constant 0 : i32
    %c0_i32_0 = arith.constant 0 : i32
    %c0_i32_1 = arith.constant 0 : i32
    return %c0_i32, %c0_i32_0 : i32, i32
  }
  func.func @transform_4(%arg0: i32) -> (i32, i32) {
    %c0_i32 = arith.constant 0 : i32
    %c0_i32_0 = arith.constant 0 : i32
    %c0_i32_1 = arith.constant 0 : i32
    return %c0_i32, %c0_i32_0 : i32, i32
  }
  func.func @transform_5(%arg0: i32) -> (i32, i32) {
    %c0_i32 = arith.constant 0 : i32
    %c0_i32_0 = arith.constant 0 : i32
    return %arg0, %c0_i32 : i32, i32
  }
  func.func @transform_6(%arg0: i32) -> (i32, i32) {
    %c0_i32 = arith.constant 0 : i32
    %c0_i32_0 = arith.constant 0 : i32
    return %arg0, %c0_i32 : i32, i32
  }
}

module attributes {stable_mosaic.version = 11 : i64} {
  func.func @_fused_kernel(%arg0: i32, %arg1: memref<8x32xf32, #tpu.memory_space<vmem>>, %arg2: memref<32x32xbf16, #tpu.memory_space<vmem>>, %arg3: memref<1x32xf32, #tpu.memory_space<vmem>>, %arg4: memref<8x32xf32, #tpu.memory_space<vmem>>, %arg5: memref<1x32xf32, #tpu.memory_space<vmem>>, %arg6: memref<1x32xf32, #tpu.memory_space<vmem>>, %arg7: memref<32x6xbf16, #tpu.memory_space<vmem>>, %arg8: memref<1x6xf32, #tpu.memory_space<vmem>>, %arg9: memref<8x32xf32, #tpu.memory_space<vmem>>, %arg10: memref<8x6xf32, #tpu.memory_space<vmem>>) attributes {dimension_semantics = [#tpu.dimension_semantics<parallel>], iteration_bounds = array<i64: 2>, scalar_prefetch = 0 : i64, scratch_operands = 0 : i64, tpu.core_type = #tpu.core_type<tc>, window_params = [{transform_indices = @transform_0, window_bounds = array<i64: 8, 32>}, {pipeline_mode = #tpu.pipeline_mode<synchronous>, transform_indices = @transform_1, window_bounds = array<i64: 32, 32>}, {pipeline_mode = #tpu.pipeline_mode<synchronous>, transform_indices = @transform_2, window_bounds = array<i64: 1, 32>}, {transform_indices = @transform_3, window_bounds = array<i64: 8, 32>}, {pipeline_mode = #tpu.pipeline_mode<synchronous>, transform_indices = @transform_4, window_bounds = array<i64: 1, 32>}, {pipeline_mode = #tpu.pipeline_mode<synchronous>, transform_indices = @transform_5, window_bounds = array<i64: 1, 32>}, {pipeline_mode = #tpu.pipeline_mode<synchronous>, transform_indices = @transform_6, window_bounds = array<i64: 32, 6>}, {pipeline_mode = #tpu.pipeline_mode<synchronous>, transform_indices = @transform_7, window_bounds = array<i64: 1, 6>}, {transform_indices = @transform_8, window_bounds = array<i64: 8, 32>}, {transform_indices = @transform_9, window_bounds = array<i64: 8, 6>}]} {
    %c0 = arith.constant 0 : index
    %c0_0 = arith.constant 0 : index
    %0 = vector.load %arg1[%c0, %c0_0] : memref<8x32xf32, #tpu.memory_space<vmem>>, vector<8x32xf32>
    %1 = arith.truncf %0 : vector<8x32xf32> to vector<8x32xbf16>
    %c0_1 = arith.constant 0 : index
    %c0_2 = arith.constant 0 : index
    %2 = vector.load %arg2[%c0_1, %c0_2] : memref<32x32xbf16, #tpu.memory_space<vmem>>, vector<32x32xbf16>
    %cst = arith.constant dense<0.000000e+00> : vector<8x32xf32>
    %3 = tpu.matmul %1, %2, %cst {dimension_numbers = #tpu.dot_dimension_numbers<[1], [0], [0], [1], [0, 0, 1, 1], [], []>} : vector<8x32xbf16>, vector<32x32xbf16>, vector<8x32xf32> -> vector<8x32xf32>
    %c0_3 = arith.constant 0 : index
    %c0_4 = arith.constant 0 : index
    %4 = vector.load %arg3[%c0_3, %c0_4] : memref<1x32xf32, #tpu.memory_space<vmem>>, vector<1x32xf32>
    %5 = vector.broadcast %4 : vector<1x32xf32> to vector<8x32xf32>
    %6 = arith.addf %3, %5 : vector<8x32xf32>
    %cst_5 = arith.constant 0.000000e+00 : f32
    %7 = vector.broadcast %cst_5 : f32 to vector<8x32xf32>
    %8 = arith.maximumf %6, %7 : vector<8x32xf32>
    %c0_6 = arith.constant 0 : index
    %c0_7 = arith.constant 0 : index
    %9 = vector.load %arg4[%c0_6, %c0_7] : memref<8x32xf32, #tpu.memory_space<vmem>>, vector<8x32xf32>
    %10 = arith.addf %8, %9 : vector<8x32xf32>
    %c0_8 = arith.constant 0 : index
    %c0_9 = arith.constant 0 : index
    %11 = vector.load %arg5[%c0_8, %c0_9] : memref<1x32xf32, #tpu.memory_space<vmem>>, vector<1x32xf32>
    %12 = vector.broadcast %11 : vector<1x32xf32> to vector<8x32xf32>
    %13 = arith.mulf %10, %12 : vector<8x32xf32>
    %c0_10 = arith.constant 0 : index
    %c0_11 = arith.constant 0 : index
    %14 = vector.load %arg6[%c0_10, %c0_11] : memref<1x32xf32, #tpu.memory_space<vmem>>, vector<1x32xf32>
    %15 = vector.broadcast %14 : vector<1x32xf32> to vector<8x32xf32>
    %16 = arith.addf %13, %15 : vector<8x32xf32>
    %c0_12 = arith.constant 0 : index
    %c0_13 = arith.constant 0 : index
    %17 = vector.load %arg9[%c0_12, %c0_13] : memref<8x32xf32, #tpu.memory_space<vmem>>, vector<8x32xf32>
    tpu.vector_store %arg9[%c0_12, %c0_13], %16 {strides = array<i32>} : memref<8x32xf32, #tpu.memory_space<vmem>>, vector<8x32xf32>,
    %18 = arith.truncf %16 : vector<8x32xf32> to vector<8x32xbf16>
    %c0_14 = arith.constant 0 : index
    %c0_15 = arith.constant 0 : index
    %19 = vector.load %arg7[%c0_14, %c0_15] : memref<32x6xbf16, #tpu.memory_space<vmem>>, vector<32x6xbf16>
    %cst_16 = arith.constant dense<0.000000e+00> : vector<8x6xf32>
    %20 = tpu.matmul %18, %19, %cst_16 {dimension_numbers = #tpu.dot_dimension_numbers<[1], [0], [0], [1], [0, 0, 1, 1], [], []>} : vector<8x32xbf16>, vector<32x6xbf16>, vector<8x6xf32> -> vector<8x6xf32>
    %c0_17 = arith.constant 0 : index
    %c0_18 = arith.constant 0 : index
    %21 = vector.load %arg8[%c0_17, %c0_18] : memref<1x6xf32, #tpu.memory_space<vmem>>, vector<1x6xf32>
    %22 = vector.broadcast %21 : vector<1x6xf32> to vector<8x6xf32>
    %23 = arith.addf %20, %22 : vector<8x6xf32>
    %c0_19 = arith.constant 0 : index
    %c0_20 = arith.constant 0 : index
    %24 = vector.load %arg10[%c0_19, %c0_20] : memref<8x6xf32, #tpu.memory_space<vmem>>, vector<8x6xf32>
    tpu.vector_store %arg10[%c0_19, %c0_20], %23 {strides = array<i32>} : memref<8x6xf32, #tpu.memory_space<vmem>>, vector<8x6xf32>,
    return
  }
  func.func @transform_0(%arg0: i32) -> (i32, i32) {
    %c0_i32 = arith.constant 0 : i32
    %c0_i32_0 = arith.constant 0 : i32
    return %arg0, %c0_i32 : i32, i32
  }
  func.func @transform_1(%arg0: i32) -> (i32, i32) {
    %c0_i32 = arith.constant 0 : i32
    %c0_i32_0 = arith.constant 0 : i32
    %c0_i32_1 = arith.constant 0 : i32
    return %c0_i32, %c0_i32_0 : i32, i32
  }
  func.func @transform_2(%arg0: i32) -> (i32, i32) {
    %c0_i32 = arith.constant 0 : i32
    %c0_i32_0 = arith.constant 0 : i32
    %c0_i32_1 = arith.constant 0 : i32
    return %c0_i32, %c0_i32_0 : i32, i32
  }
  func.func @transform_3(%arg0: i32) -> (i32, i32) {
    %c0_i32 = arith.constant 0 : i32
    %c0_i32_0 = arith.constant 0 : i32
    return %arg0, %c0_i32 : i32, i32
  }
  func.func @transform_4(%arg0: i32) -> (i32, i32) {
    %c0_i32 = arith.constant 0 : i32
    %c0_i32_0 = arith.constant 0 : i32
    %c0_i32_1 = arith.constant 0 : i32
    return %c0_i32, %c0_i32_0 : i32, i32
  }
  func.func @transform_5(%arg0: i32) -> (i32, i32) {
    %c0_i32 = arith.constant 0 : i32
    %c0_i32_0 = arith.constant 0 : i32
    %c0_i32_1 = arith.constant 0 : i32
    return %c0_i32, %c0_i32_0 : i32, i32
  }
  func.func @transform_6(%arg0: i32) -> (i32, i32) {
    %c0_i32 = arith.constant 0 : i32
    %c0_i32_0 = arith.constant 0 : i32
    %c0_i32_1 = arith.constant 0 : i32
    return %c0_i32, %c0_i32_0 : i32, i32
  }
  func.func @transform_7(%arg0: i32) -> (i32, i32) {
    %c0_i32 = arith.constant 0 : i32
    %c0_i32_0 = arith.constant 0 : i32
    %c0_i32_1 = arith.constant 0 : i32
    return %c0_i32, %c0_i32_0 : i32, i32
  }
  func.func @transform_8(%arg0: i32) -> (i32, i32) {
    %c0_i32 = arith.constant 0 : i32
    %c0_i32_0 = arith.constant 0 : i32
    return %arg0, %c0_i32 : i32, i32
  }
  func.func @transform_9(%arg0: i32) -> (i32, i32) {
    %c0_i32 = arith.constant 0 : i32
    %c0_i32_0 = arith.constant 0 : i32
    return %arg0, %c0_i32 : i32, i32
  }
}

module attributes {stable_mosaic.version = 11 : i64} {
  func.func @_fused_kernel(%arg0: i32, %arg1: memref<16x49xbf16, #tpu.memory_space<vmem>>, %arg2: memref<49x32xbf16, #tpu.memory_space<vmem>>, %arg3: memref<1x32xf32, #tpu.memory_space<vmem>>, %arg4: memref<16x32xf32, #tpu.memory_space<vmem>>, %arg5: memref<16x32xf32, #tpu.memory_space<vmem>>) attributes {dimension_semantics = [#tpu.dimension_semantics<parallel>], iteration_bounds = array<i64: 2>, scalar_prefetch = 0 : i64, scratch_operands = 0 : i64, tpu.core_type = #tpu.core_type<tc>, window_params = [{transform_indices = @transform_0, window_bounds = array<i64: 16, 49>}, {pipeline_mode = #tpu.pipeline_mode<synchronous>, transform_indices = @transform_1, window_bounds = array<i64: 49, 32>}, {pipeline_mode = #tpu.pipeline_mode<synchronous>, transform_indices = @transform_2, window_bounds = array<i64: 1, 32>}, {transform_indices = @transform_3, window_bounds = array<i64: 16, 32>}, {transform_indices = @transform_4, window_bounds = array<i64: 16, 32>}]} {
    %c0 = arith.constant 0 : index
    %c0_0 = arith.constant 0 : index
    %0 = vector.load %arg1[%c0, %c0_0] : memref<16x49xbf16, #tpu.memory_space<vmem>>, vector<16x49xbf16>
    %c0_1 = arith.constant 0 : index
    %c0_2 = arith.constant 0 : index
    %1 = vector.load %arg2[%c0_1, %c0_2] : memref<49x32xbf16, #tpu.memory_space<vmem>>, vector<49x32xbf16>
    %cst = arith.constant dense<0.000000e+00> : vector<16x32xf32>
    %2 = tpu.matmul %0, %1, %cst {dimension_numbers = #tpu.dot_dimension_numbers<[1], [0], [0], [1], [0, 0, 1, 1], [], []>} : vector<16x49xbf16>, vector<49x32xbf16>, vector<16x32xf32> -> vector<16x32xf32>
    %c0_3 = arith.constant 0 : index
    %c0_4 = arith.constant 0 : index
    %3 = vector.load %arg3[%c0_3, %c0_4] : memref<1x32xf32, #tpu.memory_space<vmem>>, vector<1x32xf32>
    %4 = vector.broadcast %3 : vector<1x32xf32> to vector<16x32xf32>
    %5 = arith.addf %2, %4 : vector<16x32xf32>
    %c0_5 = arith.constant 0 : index
    %c0_6 = arith.constant 0 : index
    %6 = vector.load %arg4[%c0_5, %c0_6] : memref<16x32xf32, #tpu.memory_space<vmem>>, vector<16x32xf32>
    %7 = arith.addf %5, %6 : vector<16x32xf32>
    %c0_7 = arith.constant 0 : index
    %c0_8 = arith.constant 0 : index
    %8 = vector.load %arg5[%c0_7, %c0_8] : memref<16x32xf32, #tpu.memory_space<vmem>>, vector<16x32xf32>
    tpu.vector_store %arg5[%c0_7, %c0_8], %7 {strides = array<i32>} : memref<16x32xf32, #tpu.memory_space<vmem>>, vector<16x32xf32>,
    return
  }
  func.func @transform_0(%arg0: i32) -> (i32, i32) {
    %c0_i32 = arith.constant 0 : i32
    %c0_i32_0 = arith.constant 0 : i32
    return %arg0, %c0_i32 : i32, i32
  }
  func.func @transform_1(%arg0: i32) -> (i32, i32) {
    %c0_i32 = arith.constant 0 : i32
    %c0_i32_0 = arith.constant 0 : i32
    %c0_i32_1 = arith.constant 0 : i32
    return %c0_i32, %c0_i32_0 : i32, i32
  }
  func.func @transform_2(%arg0: i32) -> (i32, i32) {
    %c0_i32 = arith.constant 0 : i32
    %c0_i32_0 = arith.constant 0 : i32
    %c0_i32_1 = arith.constant 0 : i32
    return %c0_i32, %c0_i32_0 : i32, i32
  }
  func.func @transform_3(%arg0: i32) -> (i32, i32) {
    %c0_i32 = arith.constant 0 : i32
    %c0_i32_0 = arith.constant 0 : i32
    return %arg0, %c0_i32 : i32, i32
  }
  func.func @transform_4(%arg0: i32) -> (i32, i32) {
    %c0_i32 = arith.constant 0 : i32
    %c0_i32_0 = arith.constant 0 : i32
    return %arg0, %c0_i32 : i32, i32
  }
}

</mosaic_0001>

<bundles_post_ra>
// kernel: custom-call.2
= control target key start
LH: loop header
LB: loop body
LE: loop exit
PB: predicated region body
PF: predicated region fallthrough
CT: control target
= control target key end

     0   :  { %s6_s0 = inlined_call_operand.vmem [shape: u32[28], index: 0, kind: output, shape index: {}]  }

// kernel: graph_enc_dec_forward.26
= control target key start
LH: loop header
LB: loop body
LE: loop exit
PB: predicated region body
PF: predicated region fallthrough
CT: control target
= control target key end

     0   :  { %s883_s18 = smov 0   ;;  %s1021_s0 = inlined_call_operand.vmem [shape: f32[28,392], index: 0, kind: input, shape index: {}]   ;;  %s1022_s1 = inlined_call_operand.vmem [shape: bf16[392,23], index: 1, kind: input, shape index: {}]   ;;  %s1023_s2 = inlined_call_operand.vmem [shape: f32[28,49], index: 2, kind: input, shape index: {}]   ;;  %s1024_s3 = inlined_call_operand.vmem [shape: bf16[49,23], index: 3, kind: input, shape index: {}]   ;;  %s1025_s4 = inlined_call_operand.vmem [shape: f32[1,23], index: 4, kind: input, shape index: {}]   ;;  %s1026_s5 = inlined_call_operand.vmem [shape: f32[28,23], index: 5, kind: output, shape index: {}]  }
   0x1 LB: > { %s716_s19 = sadd.s32 4294967295, %s848_s18   ;;  %p720_p0 = scmp.ge.s32.totalorder %s848_s18, 1  ;;  %s848_s18 = sphi %s883_s18, %s15_s18  }
   0x2   : > { %p200_p1 = scmp.lt.s32.totalorder %s848_s18, 3 }
   0x4   : > { %p201_p2 = pnand %p720_p0, %p200_p1 }
   0x5   : > { %s721_s22 = sshll.u32 (!%p201_p2), %s716_s19, 1 }
   0x6   : > { %204 = sbr.rel (%p201_p2) target bundleno = 272 (0x110), region = 40  ;;  %p235_p3 = scmp.lt.s32.totalorder (!%p201_p2), %s721_s22, 3 }
   0xb   : > { %v813_v0 = vld [vmem:[%s1024_s3 + $0x18] ss:$0 sps:$4 sm:$0x11]   ;;  %v850_v1 = vmov 0.0   ;;  %vm350_vm0 = vcmask 1040384   ;;  %v851_v2 = vmov 0  }
   0xc   : > { %790 = vmatprep.subr.bf16.mxu1 %v850_v1  ;;  %v352_v3 = vsel %vm350_vm0, 65535, %v851_v2  ;;  %593 = vmatprep.subr.bf16.mxu0 %v851_v2  ;;  %vm852_vm1 = vmmov 0   ;;  %v814_v5 = vld [vmem:[%s1024_s3 + $0x10] sm:$0xff]   ;;  %v817_v6 = vld [vmem:[%s1022_s1 + $0xb8] sm:$0xff]   ;;  %s1028_s22 = smov (!%p235_p3, %s721_s22), 3  ;;  %v815_v8 = vld [vmem:[%s1024_s3 + $0x8] sm:$0xff]  }
   0xd   : > { %v354_v4 = vand.u32 %v813_v0, %v352_v3  ;;  %798 = vmatprep.mubr.msk.bf16.mxu1 %vm852_vm1, %v850_v1  ;;  %594 = vmatpush1.bf16.msra.mxu0 %v817_v6  ;;  %v820_v7 = vld [vmem:[%s1022_s1 + $0xb0] sm:$0xff]   ;;  %s725_s6 = sshll.u32 %s1028_s22, 3  ;;  %v816_v9 = vld [vmem:[%s1024_s3] sm:$0xff]   ;;  %v823_v10 = vld [vmem:[%s1022_s1 + $0xa8] sm:$0xff]   ;;  %vm346_vm2 = vcmask 400384   ;;  %s762_s30 = sshll.u32 %s1028_s22, 5 }
   0xe   : > { %595 = vmatprep.subr.bf16.mxu0 %v851_v2  ;;  %s245_s9 = scalar_lea.vmem %s1023_s2, %s725_s6  ;;  %v818_v13 = vld [vmem:[%s1022_s1 + $0x78] sm:$0xff]   ;;  %v826_v14 = vld [vmem:[%s1022_s1 + $0xa0] sm:$0xff]   ;;  %v821_v17 = vld [vmem:[%s1022_s1 + $0x70] sm:$0xff]   ;;  %s958_s13 = scalar_lea.vmem %s1021_s0, %s762_s30  ;;  %vm544_vm3 = vcmask 64512   ;;  %vm548_vm4 = vcmask 1043456   ;;  %vm645_vm5 = vcmask 187392  }
   0xf   : > { %791 = vmatpush3.bf16.msra.mxu1 %v354_v4  ;;  %v315_v11 = vld [vmem:[%s245_s9] sm:$0xff]  ;;  %v316_v12 = vld [vmem:[%s245_s9 + $0x8] sm:$0xff]  ;;  %v819_v16 = vld [vmem:[%s1022_s1 + $0x38] sm:$0xff]   ;;  %s251_s24 = scalar_lea.vmem %s1026_s5, %s725_s6 }
  0x10   : > { %792 = vmatprep.subr.bf16.mxu1 %v850_v1  ;;  %v317_v15 = vpack.c.bf16 %v316_v12, %v315_v11  ;;  %v829_v18 = vld [vmem:[%s1022_s1 + $0x98] sm:$0xff]   ;;  %v822_v19 = vld [vmem:[%s1022_s1 + $0x30] sm:$0xff]   ;;  %v824_v20 = vld [vmem:[%s1022_s1 + $0x68] sm:$0xff]  }
  0x11   : > { %596 = vmatpush1.bf16.msra.mxu0 %v820_v7  ;;  %v832_v21 = vld [vmem:[%s1022_s1 + $0x90] sm:$0xff]   ;;  %v825_v22 = vld [vmem:[%s1022_s1 + $0x28] sm:$0xff]   ;;  %v827_v23 = vld [vmem:[%s1022_s1 + $0x60] sm:$0xff]  }
  0x12   : > { %597 = vmatprep.subr.bf16.mxu0 %v851_v2  ;;  %v835_v24 = vld [vmem:[%s1022_s1 + $0x88] sm:$0xff]   ;;  %v828_v25 = vld [vmem:[%s1022_s1 + $0x20] sm:$0xff]   ;;  %v830_v26 = vld [vmem:[%s1022_s1 + $0x58] sm:$0xff]  }
  0x13   : > { %793 = vmatpush3.bf16.msra.mxu1 %v814_v5  ;;  %v255_v27 = vld [vmem:[%s958_s13 + $0x8] sm:$0xff]  ;;  %v257_v29 = vld [vmem:[%s958_s13 + $0x18] sm:$0xff]  ;;  %v838_v31 = vld [vmem:[%s1022_s1 + $0x80] sm:$0xff]  }
  0x14   : > { %794 = vmatprep.subr.bf16.mxu1 %v850_v1  ;;  %v259_v28 = vld [vmem:[%s958_s13 + $0x28] sm:$0xff]  ;;  %v261_v30 = vld [vmem:[%s958_s13 + $0x38] sm:$0xff]  ;;  %v841_v34 = vld [vmem:[%s1022_s1 + $0xc0] ss:$0 sps:$4 sm:$0xff]  }
  0x15   : > { %598 = vmatpush1.bf16.msra.mxu0 %v823_v10  ;;  %v263_v32 = vpack.c.bf16 %v259_v28, %v255_v27  ;;  %v265_v33 = vpack.c.bf16 %v261_v30, %v257_v29  ;;  %v831_v35 = vld [vmem:[%s1022_s1 + $0x18] sm:$0xff]   ;;  %v833_v36 = vld [vmem:[%s1022_s1 + $0x50] sm:$0xff]   ;;  %v550_v39 = vsel %vm548_vm4, %v841_v34, 0  ;;  %v836_v41 = vld [vmem:[%s1022_s1 + $0x48] sm:$0xff]  }
  0x16   : > { %599 = vmatprep.subr.bf16.mxu0 %v851_v2  ;;  %v256_v37 = vld [vmem:[%s958_s13 + $0x10] sm:$0xff]  ;;  %v837_v43 = vld [vmem:[%s1022_s1 + $0x8] sm:$0xff]   ;;  %v839_v44 = vld [vmem:[%s1022_s1 + $0x40] sm:$0xff]  }
  0x17   : > { %795 = vmatpush3.bf16.msra.mxu1 %v815_v8  ;;  %758 = vmatprep.mubr.msk.bf16.mxu0 %vm544_vm3, %v265_v33  ;;  %v260_v38 = vld [vmem:[%s958_s13 + $0x30] sm:$0xff]  ;;  %v840_v45 = vld [vmem:[%s1022_s1] sm:$0xff]  }
  0x18   : > { %796 = vmatprep.subr.bf16.mxu1 %v850_v1  ;;  %v834_v40 = vld [vmem:[%s1022_s1 + $0x10] sm:$0xff]   ;;  %v264_v42 = vpack.c.bf16 %v260_v38, %v256_v37  ;;  %v254_v46 = vld [vmem:[%s958_s13] sm:$0xff] }
  0x19   : > { %600 = vmatpush1.bf16.msra.mxu0 %v826_v14  ;;  %v258_v47 = vld [vmem:[%s958_s13 + $0x20] sm:$0xff] }
  0x1a   : > { %601 = vmatprep.subr.bf16.mxu0 %v851_v2  ;;  %v262_v48 = vpack.c.bf16 %v258_v47, %v254_v46  ;;  %v759_v62 = vld [vmem:[%s1025_s4] ss:$0 sm:$0xff] }
  0x1b   : > { %797 = vmatpush3.bf16.msra.mxu1 %v816_v9 }
  0x1c   : > { %768 = vmatprep.subr.bf16.mxu1 %v818_v13 }
  0x1d   : > { %602 = vmatpush1.bf16.msra.mxu0 %v829_v18 }
  0x1e   : > { %799 = vmatmul.mubr.msk.bf16.vlgmr.msra.gmra.mxu1 %vm346_vm2, %v317_v15  ;;  %603 = vmatprep.subr.bf16.mxu0 %v851_v2 }
  0x1f   : > { %769 = vmatpush3.bf16.msra.mxu1 %v819_v16  ;;  %584 = vmatprep.mubr.bf16.mxu1 %v263_v32 }
  0x20   : > { %770 = vmatprep.subr.bf16.mxu1 %v821_v17 }
  0x21   : > { %604 = vmatpush1.bf16.msra.mxu0 %v832_v21 }
  0x22   : > { %605 = vmatprep.subr.bf16.mxu0 %v851_v2 }
  0x23   : > { %771 = vmatpush3.bf16.msra.mxu1 %v822_v19 }
  0x24   : > { %772 = vmatprep.subr.bf16.mxu1 %v824_v20 }
  0x25   : > { %606 = vmatpush1.bf16.msra.mxu0 %v835_v24 }
  0x26   : > { %607 = vmatprep.subr.bf16.mxu0 %v851_v2 }
  0x27   : > { %773 = vmatpush3.bf16.msra.mxu1 %v825_v22 }
  0x28   : > { %774 = vmatprep.subr.bf16.mxu1 %v827_v23 }
  0x29   : > { %608 = vmatpush1.bf16.msra.mxu0 %v838_v31 }
  0x2a   : > { %623 = vmatprep.subr.bf16.mxu0 %v851_v2 }
  0x2b   : > { %775 = vmatpush3.bf16.msra.mxu1 %v828_v25 }
  0x2c   : > { %776 = vmatprep.subr.bf16.mxu1 %v830_v26 }
  0x2d   : > { %624 = vmatpush2.bf16.msra.mxu0 %v550_v39 }
  0x2f   : > { %777 = vmatpush3.bf16.msra.mxu1 %v831_v35 }
  0x30   : > { %778 = vmatprep.subr.bf16.mxu1 %v833_v36  ;;  %626 = vmatmul.mubr.bf16.vlgmr.msra.gmra.mxu0 %v264_v42 }
  0x33   : > { %779 = vmatpush3.bf16.msra.mxu1 %v834_v40 }
  0x34   : > { %780 = vmatprep.subr.bf16.mxu1 %v836_v41 }
  0x37   : > { %781 = vmatpush3.bf16.msra.mxu1 %v837_v43 }
  0x38   : > { %782 = vmatprep.subr.bf16.mxu1 %v839_v44 }
  0x3b   : > { %783 = vmatpush3.bf16.msra.mxu1 %v840_v45 }
  0x3e   : > { %585 = vmatmul.mubr.bf16.vlgmr.msra.gmra.mxu1 %v262_v48 }
  0xde   : > { %v390_v49 = vpop.f32.mrf.mxu1 }
  0xe0   : > { %v800_v50 = vpop.f32.mrf.mxu1 }
  0xe2   : > { %v393_v51 = vpop.f32.mrf.mxu1 }
  0xe4   : > { %v801_v52 = vpop.f32.mrf.mxu1 }
  0xf0   : > { %v627_v53 = vpop.f32.mrf.mxu0 }
  0xf2   : > { %v629_v54 = vpop.f32.mrf.mxu0 }
  0xf4   : > { %v630_v55 = vpop.f32.mrf.mxu0 }
  0xf6   : > { %v632_v56 = vpop.f32.mrf.mxu0 }
  0xfe   : > { %v784_v57 = vpop.f32.mrf.mxu1 }
 0x100   : > { %v785_v58 = vpop.f32.mrf.mxu1 }
 0x101   : > { %v786_v59 = vadd.f32 %v785_v58, %v784_v57 }
 0x102   : > { %v787_v60 = vpop.f32.mrf.mxu1 }
 0x103   : > { %v587_v61 = vadd.f32 %v786_v59, %v390_v49 }
 0x104   : > { %v788_v63 = vpop.f32.mrf.mxu1 }
 0x105   : > { %v628_v0 = vadd.f32 %v627_v53, %v587_v61  ;;  %v789_v1 = vadd.f32 %v788_v63, %v787_v60 }
 0x107   : > { %v641_v2 = vadd.f32 %v759_v62, %v628_v0  ;;  %v590_v3 = vadd.f32 %v789_v1, %v393_v51 }
 0x109   : > { %v643_v4 = vmax.f32 %v641_v2, 0.0  ;;  %v631_v5 = vadd.f32 %v630_v55, %v590_v3 }
 0x10b   : > { %646 = vst.msk [vmem:[%s251_s24] sm:$0xff] %vm645_vm5, %v643_v4  ;;  %v642_v6 = vadd.f32 %v759_v62, %v631_v5 }
 0x10d   : > { %v644_v7 = vmax.f32 %v642_v6, 0.0 }
 0x10f   : > { %647 = vst.msk [vmem:[%s251_s24 + $0x8] sm:$0xff] %vm645_vm5, %v644_v7 }
 0x110 PF: > { %s15_s18 = sadd.s32 1, %s848_s18  }
 0x111   : > { %p12_p4 = scmp.ge.s32.totalorder %s15_s18, 4  }
 0x113   :  { %14 = sbr.rel (!%p12_p4) target bundleno = 1 (0x1), region = 73 }

// kernel: graph_enc_dec_forward.30
= control target key start
LH: loop header
LB: loop body
LE: loop exit
PB: predicated region body
PF: predicated region fallthrough
CT: control target
= control target key end

     0   :  { %s660_s18 = smov 0   ;;  %s753_s0 = inlined_call_operand.vmem [shape: f32[28,184], index: 0, kind: input, shape index: {}]   ;;  %s754_s1 = inlined_call_operand.vmem [shape: bf16[184,32], index: 1, kind: input, shape index: {}]   ;;  %s755_s2 = inlined_call_operand.vmem [shape: f32[28,23], index: 2, kind: input, shape index: {}]   ;;  %s756_s3 = inlined_call_operand.vmem [shape: bf16[23,32], index: 3, kind: input, shape index: {}]   ;;  %s757_s4 = inlined_call_operand.vmem [shape: f32[1,32], index: 4, kind: input, shape index: {}]   ;;  %s758_s5 = inlined_call_operand.vmem [shape: f32[28,32], index: 5, kind: output, shape index: {}]  }
   0x1 LB: > { %s549_s19 = sadd.s32 4294967295, %s624_s18   ;;  %p553_p0 = scmp.ge.s32.totalorder %s624_s18, 1  ;;  %s624_s18 = sphi %s660_s18, %s15_s18  }
   0x2   : > { %p200_p1 = scmp.lt.s32.totalorder %s624_s18, 3 }
   0x4   : > { %p201_p2 = pnand %p553_p0, %p200_p1 }
   0x5   : > { %s554_s30 = sshll.u32 (!%p201_p2), %s549_s19, 1 }
   0x6   : > { %204 = sbr.rel (%p201_p2) target bundleno = 264 (0x108), region = 40  ;;  %p235_p3 = scmp.lt.s32.totalorder (!%p201_p2), %s554_s30, 3 }
   0xb   : > { %v604_v0 = vld [vmem:[%s754_s1 + $0x38] sm:$0xff]   ;;  %v626_v1 = vmov 0   ;;  %v605_v2 = vld [vmem:[%s754_s1 + $0x30] sm:$0xff]   ;;  %v627_v3 = vmov 0.0   ;;  %vm302_vm0 = vcmask 1042432   ;;  %vm303_vm1 = vcmask 1043456  }
   0xc   : > { %426 = vmatprep.subr.bf16.mxu1 %v626_v1  ;;  %584 = vmatprep.subr.bf16.mxu0 %v627_v3  ;;  %v628_v4 = vmov 65535   ;;  %v606_v6 = vld [vmem:[%s754_s1 + $0x28] sm:$0xff]   ;;  %vm629_vm2 = vmmov 0   ;;  %v607_v9 = vld [vmem:[%s754_s1 + $0x20] sm:$0xff]   ;;  %v608_v12 = vld [vmem:[%s754_s1 + $0x18] sm:$0xff]   ;;  %s760_s30 = smov (!%p235_p3, %s554_s30), 3 }
   0xd   : > { %427 = vmatpush1.bf16.msra.mxu1 %v604_v0  ;;  %v304_v5 = vsel %vm302_vm0, 4294967295, %v628_v4  ;;  %588 = vmatprep.mubr.msk.bf16.mxu0 %vm629_vm2, %v627_v3  ;;  %v613_v8 = vld [vmem:[%s756_s3 + $0x8] ss:$0 sps:$4 sm:$0xff]   ;;  %v615_v11 = vld [vmem:[%s756_s3] sm:$0xff]   ;;  %s558_s10 = sshll.u32 %s760_s30, 3  ;;  %s580_s11 = sshll.u32 %s760_s30, 4 }
   0xe   : > { %428 = vmatprep.subr.bf16.mxu1 %v626_v1  ;;  %v305_v7 = vsel %vm303_vm1, %v304_v5, 0  ;;  %v609_v13 = vld [vmem:[%s754_s1 + $0x10] sm:$0xff]   ;;  %s245_s16 = scalar_lea.vmem %s755_s2, %s558_s10  ;;  %s710_s20 = scalar_lea.vmem %s753_s0, %s580_s11  ;;  %vm298_vm3 = vcmask 187392   ;;  %vm419_vm4 = vcmask 457728   ;;  %v610_v20 = vld [vmem:[%s754_s1 + $0x8] sm:$0xff]   ;;  %v611_v21 = vld [vmem:[%s754_s1] sm:$0xff]  }
   0xf   : > { %v307_v10 = vand.u32 %v613_v8, %v305_v7  ;;  %v283_v14 = vld [vmem:[%s245_s16] sm:$0xff]  ;;  %v284_v15 = vld [vmem:[%s245_s16 + $0x8] sm:$0xff]  ;;  %v257_v18 = vld [vmem:[%s710_s20 + $0x18] sm:$0xff]  ;;  %s251_s14 = scalar_lea.vmem %s758_s5, %s558_s10  ;;  %vm478_vm5 = vcmask 261120  }
  0x10   : > { %v255_v16 = vld [vmem:[%s710_s20 + $0x8] sm:$0xff]  ;;  %v285_v17 = vpack.c.bf16 %v284_v15, %v283_v14  ;;  %v612_v22 = vld [vmem:[%s754_s1 + $0x58] ss:$0 sps:$4 sm:$0xff]   ;;  %v614_v24 = vld [vmem:[%s754_s1 + $0x50] sm:$0xff]  }
  0x11   : > { %429 = vmatpush1.bf16.msra.mxu1 %v605_v2  ;;  %585 = vmatpush3.bf16.msra.mxu0 %v307_v10  ;;  %v259_v19 = vpack.c.bf16 %v257_v18, %v255_v16  ;;  %v424_v23 = vsel %vm303_vm1, %v612_v22, 0  ;;  %v616_v25 = vld [vmem:[%s754_s1 + $0x48] sm:$0xff]   ;;  %v617_v26 = vld [vmem:[%s754_s1 + $0x40] sm:$0xff]   ;;  %v256_v28 = vld [vmem:[%s710_s20 + $0x10] sm:$0xff] }
  0x12   : > { %430 = vmatprep.subr.bf16.mxu1 %v626_v1  ;;  %586 = vmatprep.subr.bf16.mxu0 %v627_v3  ;;  %v254_v27 = vld [vmem:[%s710_s20] sm:$0xff] }
  0x13   : > { %576 = vmatprep.mubr.msk.bf16.mxu1 %vm419_vm4, %v259_v19  ;;  %v258_v29 = vpack.c.bf16 %v256_v28, %v254_v27  ;;  %v577_v35 = vld [vmem:[%s757_s4] ss:$0 sm:$0xff] }
  0x15   : > { %431 = vmatpush1.bf16.msra.mxu1 %v606_v6  ;;  %587 = vmatpush3.bf16.msra.mxu0 %v615_v11 }
  0x16   : > { %432 = vmatprep.subr.bf16.mxu1 %v626_v1 }
  0x18   : > { %589 = vmatmul.mubr.msk.bf16.vlgmr.msra.gmra.mxu0 %vm298_vm3, %v285_v17 }
  0x19   : > { %433 = vmatpush1.bf16.msra.mxu1 %v607_v9 }
  0x1a   : > { %434 = vmatprep.subr.bf16.mxu1 %v626_v1 }
  0x1d   : > { %435 = vmatpush1.bf16.msra.mxu1 %v608_v12 }
  0x1e   : > { %436 = vmatprep.subr.bf16.mxu1 %v626_v1 }
  0x21   : > { %437 = vmatpush1.bf16.msra.mxu1 %v609_v13 }
  0x22   : > { %438 = vmatprep.subr.bf16.mxu1 %v626_v1 }
  0x25   : > { %439 = vmatpush1.bf16.msra.mxu1 %v610_v20 }
  0x26   : > { %440 = vmatprep.subr.bf16.mxu1 %v626_v1 }
  0x29   : > { %441 = vmatpush1.bf16.msra.mxu1 %v611_v21 }
  0x2a   : > { %450 = vmatprep.subr.bf16.mxu1 %v626_v1 }
  0x2d   : > { %451 = vmatpush2.bf16.msra.mxu1 %v424_v23 }
  0x2e   : > { %452 = vmatprep.subr.bf16.mxu1 %v626_v1 }
  0x31   : > { %453 = vmatpush2.bf16.msra.mxu1 %v614_v24 }
  0x32   : > { %454 = vmatprep.subr.bf16.mxu1 %v626_v1 }
  0x35   : > { %455 = vmatpush2.bf16.msra.mxu1 %v616_v25 }
  0x36   : > { %456 = vmatprep.subr.bf16.mxu1 %v626_v1 }
  0x39   : > { %457 = vmatpush2.bf16.msra.mxu1 %v617_v26 }
  0x3c   : > { %459 = vmatmul.mubr.bf16.vlgmr.msra.gmra.mxu1 %v258_v29 }
  0xd8   : > { %v343_v30 = vpop.f32.mrf.mxu0 }
  0xda   : > { %v590_v31 = vpop.f32.mrf.mxu0 }
  0xdc   : > { %v346_v32 = vpop.f32.mrf.mxu0 }
  0xde   : > { %v591_v33 = vpop.f32.mrf.mxu0 }
  0xfc   : > { %v460_v34 = vpop.f32.mrf.mxu1 }
  0xfd   : > { %v461_v36 = vadd.f32 %v460_v34, %v343_v30 }
  0xfe   : > { %v462_v37 = vpop.f32.mrf.mxu1 }
  0xff   : > { %v474_v38 = vadd.f32 %v577_v35, %v461_v36 }
 0x100   : > { %v463_v39 = vpop.f32.mrf.mxu1 }
 0x101   : > { %v476_v40 = vmax.f32 %v474_v38, 0.0  ;;  %v464_v41 = vadd.f32 %v463_v39, %v346_v32 }
 0x102   : > { %v465_v42 = vpop.f32.mrf.mxu1 }
 0x103   : > { %479 = vst.msk [vmem:[%s251_s14] sm:$0xff] %vm478_vm5, %v476_v40  ;;  %v475_v43 = vadd.f32 %v577_v35, %v464_v41 }
 0x105   : > { %v477_v44 = vmax.f32 %v475_v43, 0.0 }
 0x107   : > { %480 = vst.msk [vmem:[%s251_s14 + $0x8] sm:$0xff] %vm478_vm5, %v477_v44 }
 0x108 PF: > { %s15_s18 = sadd.s32 1, %s624_s18  }
 0x109   : > { %p12_p4 = scmp.ge.s32.totalorder %s15_s18, 4  }
 0x10b   :  { %14 = sbr.rel (!%p12_p4) target bundleno = 1 (0x1), region = 73 }

// kernel: graph_enc_dec_forward.24
= control target key start
LH: loop header
LB: loop body
LE: loop exit
PB: predicated region body
PF: predicated region fallthrough
CT: control target
= control target key end

     0   :  { %s481_s15 = smov 0   ;;  %s516_s0 = inlined_call_operand.vmem [shape: bf16[28,49], index: 0, kind: input, shape index: {}]   ;;  %s517_s1 = inlined_call_operand.vmem [shape: bf16[49,23], index: 1, kind: input, shape index: {}]   ;;  %s518_s2 = inlined_call_operand.vmem [shape: f32[1,23], index: 2, kind: input, shape index: {}]   ;;  %s519_s3 = inlined_call_operand.vmem [shape: f32[28,23], index: 3, kind: input, shape index: {}]   ;;  %s520_s4 = inlined_call_operand.vmem [shape: f32[28,23], index: 4, kind: output, shape index: {}]  }
   0x1 LB: > { %s392_s16 = sadd.s32 4294967295, %s451_s15   ;;  %p396_p0 = scmp.ge.s32.totalorder %s451_s15, 1  ;;  %s451_s15 = sphi %s481_s15, %s14_s15  }
   0x2   : > { %p174_p1 = scmp.lt.s32.totalorder %s451_s15, 3 }
   0x4   : > { %p175_p2 = pnand %p396_p0, %p174_p1 }
   0x5   : > { %s397_s19 = sshll.u32 (!%p175_p2), %s392_s16, 1 }
   0x6   : > { %178 = sbr.rel (%p175_p2) target bundleno = 232 (0xe8), region = 36  ;;  %p206_p3 = scmp.lt.s32.totalorder (!%p175_p2), %s397_s19, 3 }
   0xb   : > { %v440_v0 = vld [vmem:[%s517_s1 + $0x18] ss:$0 sps:$4 sm:$0x11]   ;;  %v453_v1 = vmov 0.0   ;;  %vm270_vm0 = vcmask 1040384   ;;  %v454_v2 = vmov 0  }
   0xc   : > { %417 = vmatprep.subr.bf16.mxu0 %v453_v1  ;;  %v272_v3 = vsel %vm270_vm0, 65535, %v454_v2  ;;  %vm455_vm1 = vmmov 0   ;;  %v441_v5 = vld [vmem:[%s517_s1 + $0x10] sm:$0xff]   ;;  %s522_s19 = smov (!%p206_p3, %s397_s19), 3  ;;  %v442_v6 = vld [vmem:[%s517_s1 + $0x8] sm:$0xff]   ;;  %v443_v7 = vld [vmem:[%s517_s1] sm:$0xff]  }
   0xd   : > { %v274_v4 = vand.u32 %v440_v0, %v272_v3  ;;  %425 = vmatprep.mubr.msk.bf16.mxu0 %vm455_vm1, %v453_v1  ;;  %s398_s24 = sshll.u32 %s522_s19, 2  ;;  %vm266_vm2 = vcmask 400384   ;;  %s400_s30 = sshll.u32 %s522_s19, 3  ;;  %v403_v9 = vld [vmem:[%s518_s2] ss:$0 sm:$0xff]  ;;  %vm321_vm3 = vcmask 187392  }
   0xe   : > { %s209_s27 = scalar_lea.vmem %s516_s0, %s398_s24  ;;  %s215_s7 = scalar_lea.vmem %s519_s3, %s400_s30 }
   0xf   : > { %418 = vmatpush3.bf16.msra.mxu0 %v274_v4  ;;  %v444_v8 = vld [vmem:[%s209_s27] sm:$0xff]   ;;  %s221_s12 = scalar_lea.vmem %s520_s4, %s400_s30  ;;  %v318_v16 = vld [vmem:[%s215_s7 + $0x8] sm:$0xff] }
  0x10   : > { %419 = vmatprep.subr.bf16.mxu0 %v453_v1  ;;  %v317_v11 = vld [vmem:[%s215_s7] sm:$0xff] }
  0x13   : > { %420 = vmatpush3.bf16.msra.mxu0 %v441_v5 }
  0x14   : > { %421 = vmatprep.subr.bf16.mxu0 %v453_v1 }
  0x17   : > { %422 = vmatpush3.bf16.msra.mxu0 %v442_v6 }
  0x18   : > { %423 = vmatprep.subr.bf16.mxu0 %v453_v1 }
  0x1b   : > { %424 = vmatpush3.bf16.msra.mxu0 %v443_v7 }
  0x1e   : > { %426 = vmatmul.mubr.msk.bf16.vlgmr.msra.gmra.mxu0 %vm266_vm2, %v444_v8 }
  0xde   : > { %v310_v10 = vpop.f32.mrf.mxu0 }
  0xdf   : > { %v311_v12 = vadd.f32 %v403_v9, %v310_v10 }
  0xe0   : > { %v427_v13 = vpop.f32.mrf.mxu0 }
  0xe1   : > { %v319_v14 = vadd.f32 %v317_v11, %v311_v12 }
  0xe2   : > { %v313_v15 = vpop.f32.mrf.mxu0 }
  0xe3   : > { %322 = vst.msk [vmem:[%s221_s12] sm:$0xff] %vm321_vm3, %v319_v14  ;;  %v314_v17 = vadd.f32 %v403_v9, %v313_v15 }
  0xe4   : > { %v428_v18 = vpop.f32.mrf.mxu0 }
  0xe5   : > { %v320_v19 = vadd.f32 %v318_v16, %v314_v17 }
  0xe7   : > { %323 = vst.msk [vmem:[%s221_s12 + $0x8] sm:$0xff] %vm321_vm3, %v320_v19 }
  0xe8 PF: > { %s14_s15 = sadd.s32 1, %s451_s15  }
  0xe9   : > { %p11_p4 = scmp.ge.s32.totalorder %s14_s15, 4  }
  0xeb   :  { %13 = sbr.rel (!%p11_p4) target bundleno = 1 (0x1), region = 69 }

// kernel: graph_enc_dec_forward.34
= control target key start
LH: loop header
LB: loop body
LE: loop exit
PB: predicated region body
PF: predicated region fallthrough
CT: control target
= control target key end

     0   :  { %s710_s18 = smov 0   ;;  %s798_s0 = inlined_call_operand.vmem [shape: f32[28,256], index: 0, kind: input, shape index: {}]   ;;  %s799_s1 = inlined_call_operand.vmem [shape: bf16[256,32], index: 1, kind: input, shape index: {}]   ;;  %s800_s2 = inlined_call_operand.vmem [shape: f32[28,32], index: 2, kind: input, shape index: {}]   ;;  %s801_s3 = inlined_call_operand.vmem [shape: bf16[32,32], index: 3, kind: input, shape index: {}]   ;;  %s802_s4 = inlined_call_operand.vmem [shape: f32[1,32], index: 4, kind: input, shape index: {}]   ;;  %s803_s5 = inlined_call_operand.vmem [shape: f32[28,32], index: 5, kind: output, shape index: {}]  }
   0x1 LB: > { %s574_s19 = sadd.s32 4294967295, %s676_s18   ;;  %p578_p0 = scmp.ge.s32.totalorder %s676_s18, 1  ;;  %s676_s18 = sphi %s710_s18, %s15_s18  }
   0x2   : > { %p200_p1 = scmp.lt.s32.totalorder %s676_s18, 3 }
   0x4   : > { %p201_p2 = pnand %p578_p0, %p200_p1 }
   0x5   : > { %s579_s26 = sshll.u32 (!%p201_p2), %s574_s19, 1 }
   0x6   : > { %204 = sbr.rel (%p201_p2) target bundleno = 252 (0xfc), region = 40  ;;  %p235_p3 = scmp.lt.s32.totalorder (!%p201_p2), %s579_s26, 3 }
   0xb   : > { %v652_v0 = vld [vmem:[%s799_s1 + $0x78] sm:$0xff]   ;;  %v678_v2 = vmov 0.0   ;;  %v654_v3 = vld [vmem:[%s799_s1 + $0x70] sm:$0xff]   ;;  %vm679_vm0 = vmmov 0   ;;  %v656_v5 = vld [vmem:[%s799_s1 + $0x68] sm:$0xff]   ;;  %s805_s26 = smov (!%p235_p3, %s579_s26), 3 }
   0xc   : > { %v653_v1 = vld [vmem:[%s799_s1 + $0x38] sm:$0xff]   ;;  %634 = vmatprep.subr.bf16.mxu0 %v678_v2  ;;  %612 = vmatprep.subr.bf16.mxu1 %v652_v0  ;;  %v655_v4 = vld [vmem:[%s799_s1 + $0x30] sm:$0xff]   ;;  %v657_v6 = vld [vmem:[%s799_s1 + $0x28] sm:$0xff]   ;;  %s583_s14 = sshll.u32 %s805_s26, 3  ;;  %s608_s17 = sshll.u32 %s805_s26, 4  ;;  %vm311_vm1 = vcmask 261120  }
   0xd   : > { %638 = vmatprep.mubr.msk.bf16.mxu0 %vm679_vm0, %v678_v2  ;;  %613 = vmatpush3.bf16.msra.mxu1 %v653_v1  ;;  %v658_v7 = vld [vmem:[%s799_s1 + $0x60] sm:$0xff]   ;;  %v660_v9 = vld [vmem:[%s799_s1 + $0x58] sm:$0xff]   ;;  %v664_v10 = vld [vmem:[%s801_s3 + $0x8] sm:$0xff]   ;;  %s245_s25 = scalar_lea.vmem %s800_s2, %s583_s14  ;;  %s239_s29 = scalar_lea.vmem %s798_s0, %s608_s17 }
   0xe   : > { %614 = vmatprep.subr.bf16.mxu1 %v654_v3  ;;  %v659_v8 = vld [vmem:[%s799_s1 + $0x20] sm:$0xff]   ;;  %v661_v11 = vld [vmem:[%s799_s1 + $0x18] sm:$0xff]   ;;  %635 = vmatpush3.bf16.msra.mxu0 %v664_v10  ;;  %v662_v13 = vld [vmem:[%s799_s1 + $0x50] sm:$0xff]   ;;  %s251_s23 = scalar_lea.vmem %s803_s5, %s583_s14 }
   0xf   : > { %636 = vmatprep.subr.bf16.mxu0 %v678_v2  ;;  %v667_v12 = vld [vmem:[%s801_s3] sm:$0xff]   ;;  %v293_v15 = vld [vmem:[%s245_s25 + $0x8] sm:$0xff]  ;;  %v663_v17 = vld [vmem:[%s799_s1 + $0x10] sm:$0xff]  }
  0x10   : > { %v292_v14 = vld [vmem:[%s245_s25] sm:$0xff]  ;;  %v255_v16 = vld [vmem:[%s239_s29 + $0x8] sm:$0xff]  ;;  %v257_v19 = vld [vmem:[%s239_s29 + $0x18] sm:$0xff] }
  0x11   : > { %615 = vmatpush3.bf16.msra.mxu1 %v655_v4  ;;  %v294_v18 = vpack.c.bf16 %v293_v15, %v292_v14  ;;  %v665_v20 = vld [vmem:[%s799_s1 + $0x48] sm:$0xff]   ;;  %v259_v21 = vpack.c.bf16 %v257_v19, %v255_v16  ;;  %v668_v23 = vld [vmem:[%s799_s1 + $0x40] sm:$0xff]   ;;  %v256_v26 = vld [vmem:[%s239_s29 + $0x10] sm:$0xff] }
  0x12   : > { %616 = vmatprep.subr.bf16.mxu1 %v656_v5  ;;  %637 = vmatpush3.bf16.msra.mxu0 %v667_v12  ;;  %v666_v22 = vld [vmem:[%s799_s1 + $0x8] sm:$0xff]   ;;  %v669_v24 = vld [vmem:[%s799_s1] sm:$0xff]  }
  0x13   : > { %484 = vmatprep.mubr.bf16.mxu1 %v259_v21  ;;  %v254_v25 = vld [vmem:[%s239_s29] sm:$0xff] }
  0x14   : > { %v258_v27 = vpack.c.bf16 %v256_v26, %v254_v25  ;;  %v605_v35 = vld [vmem:[%s802_s4] ss:$0 sm:$0xff] }
  0x15   : > { %617 = vmatpush3.bf16.msra.mxu1 %v657_v6  ;;  %639 = vmatmul.mubr.msk.bf16.vlgmr.msra.gmra.mxu0 %vm311_vm1, %v294_v18 }
  0x16   : > { %618 = vmatprep.subr.bf16.mxu1 %v658_v7 }
  0x19   : > { %619 = vmatpush3.bf16.msra.mxu1 %v659_v8 }
  0x1a   : > { %620 = vmatprep.subr.bf16.mxu1 %v660_v9 }
  0x1d   : > { %621 = vmatpush3.bf16.msra.mxu1 %v661_v11 }
  0x1e   : > { %622 = vmatprep.subr.bf16.mxu1 %v662_v13 }
  0x21   : > { %623 = vmatpush3.bf16.msra.mxu1 %v663_v17 }
  0x22   : > { %624 = vmatprep.subr.bf16.mxu1 %v665_v20 }
  0x25   : > { %625 = vmatpush3.bf16.msra.mxu1 %v666_v22 }
  0x26   : > { %626 = vmatprep.subr.bf16.mxu1 %v668_v23 }
  0x29   : > { %627 = vmatpush3.bf16.msra.mxu1 %v669_v24 }
  0x2c   : > { %485 = vmatmul.mubr.bf16.vlgmr.msra.gmra.mxu1 %v258_v27 }
  0xd5   : > { %v349_v28 = vpop.f32.mrf.mxu0 }
  0xd7   : > { %v640_v29 = vpop.f32.mrf.mxu0 }
  0xd9   : > { %v352_v30 = vpop.f32.mrf.mxu0 }
  0xdb   : > { %v641_v31 = vpop.f32.mrf.mxu0 }
  0xec   : > { %v628_v32 = vpop.f32.mrf.mxu1 }
  0xee   : > { %v629_v33 = vpop.f32.mrf.mxu1 }
  0xef   : > { %v630_v34 = vadd.f32 %v629_v33, %v628_v32 }
  0xf0   : > { %v631_v36 = vpop.f32.mrf.mxu1 }
  0xf1   : > { %v487_v37 = vadd.f32 %v630_v34, %v349_v28 }
  0xf2   : > { %v632_v38 = vpop.f32.mrf.mxu1 }
  0xf3   : > { %v500_v39 = vadd.f32 %v605_v35, %v487_v37  ;;  %v633_v40 = vadd.f32 %v632_v38, %v631_v36 }
  0xf5   : > { %v502_v41 = vmax.f32 %v500_v39, 0.0  ;;  %v490_v42 = vadd.f32 %v633_v40, %v352_v30 }
  0xf7   : > { %504 = vst.msk [vmem:[%s251_s23] sm:$0xff] %vm311_vm1, %v502_v41  ;;  %v501_v43 = vadd.f32 %v605_v35, %v490_v42 }
  0xf9   : > { %v503_v44 = vmax.f32 %v501_v43, 0.0 }
  0xfb   : > { %505 = vst.msk [vmem:[%s251_s23 + $0x8] sm:$0xff] %vm311_vm1, %v503_v44 }
  0xfc PF: > { %s15_s18 = sadd.s32 1, %s676_s18  }
  0xfd   : > { %p12_p4 = scmp.ge.s32.totalorder %s15_s18, 4  }
  0xff   :  { %14 = sbr.rel (!%p12_p4) target bundleno = 1 (0x1), region = 73 }

// kernel: graph_enc_dec_forward.25
= control target key start
LH: loop header
LB: loop body
LE: loop exit
PB: predicated region body
PF: predicated region fallthrough
CT: control target
= control target key end

     0   :  { %s534_s18 = smov 0   ;;  %s569_s0 = inlined_call_operand.vmem [shape: f32[16,23], index: 0, kind: input, shape index: {}]   ;;  %s570_s1 = inlined_call_operand.vmem [shape: bf16[23,32], index: 1, kind: input, shape index: {}]   ;;  %s571_s2 = inlined_call_operand.vmem [shape: f32[16,23], index: 2, kind: input, shape index: {}]   ;;  %s572_s3 = inlined_call_operand.vmem [shape: bf16[23,32], index: 3, kind: input, shape index: {}]   ;;  %s573_s4 = inlined_call_operand.vmem [shape: f32[1,32], index: 4, kind: input, shape index: {}]   ;;  %s574_s5 = inlined_call_operand.vmem [shape: f32[16,32], index: 5, kind: output, shape index: {}]  }
   0x1 LB: > { %s439_s19 = sadd.s32 4294967295, %s499_s18   ;;  %p443_p0 = scmp.ge.s32.totalorder %s499_s18, 1  ;;  %s499_s18 = sphi %s534_s18, %s15_s18  }
   0x2   : > { %p195_p1 = scmp.lt.s32.totalorder %s499_s18, 3 }
   0x4   : > { %p196_p2 = pnand %p443_p0, %p195_p1 }
   0x5   : > { %p225_p3 = scmp.lt.s32.totalorder (!%p196_p2), %s439_s19, 1 }
   0x6   : > { %199 = sbr.rel (%p196_p2) target bundleno = 223 (0xdf), region = 40 }
   0xb   : > { %v489_v0 = vld [vmem:[%s572_s3 + $0x8] ss:$0 sps:$4 sm:$0xff]   ;;  %vm261_vm0 = vcmask 1042432   ;;  %v501_v1 = vmov 0.0   ;;  %vm262_vm1 = vcmask 1043456   ;;  %v502_v3 = vmov 65535  }
   0xc   : > { %462 = vmatprep.subr.bf16.mxu0 %v501_v1  ;;  %470 = vmatprep.subr.bf16.mxu1 %v501_v1  ;;  %v490_v2 = vld [vmem:[%s570_s1 + $0x8] ss:$0 sps:$4 sm:$0xff]   ;;  %v263_v4 = vsel %vm261_vm0, 4294967295, %v502_v3  ;;  %vm503_vm2 = vmmov 0   ;;  %v491_v8 = vld [vmem:[%s572_s3] sm:$0xff]   ;;  %s576_s19 = smov (!%p225_p3, %s439_s19), 1 }
   0xd   : > { %v264_v5 = vsel %vm262_vm1, %v263_v4, 0  ;;  %466 = vmatprep.mubr.msk.bf16.mxu0 %vm503_vm2, %v501_v1  ;;  %474 = vmatprep.mubr.msk.bf16.mxu1 %vm503_vm2, %v501_v1  ;;  %v492_v9 = vld [vmem:[%s570_s1] sm:$0xff]   ;;  %s444_s28 = sshll.u32 %s576_s19, 3  ;;  %vm257_vm3 = vcmask 187392   ;;  %vm372_vm4 = vcmask 261120  }
   0xe   : > { %v266_v6 = vand.u32 %v489_v0, %v264_v5  ;;  %v321_v7 = vand.u32 %v490_v2, %v264_v5  ;;  %s232_s6 = scalar_lea.vmem %s571_s2, %s444_s28  ;;  %s228_s9 = scalar_lea.vmem %s569_s0, %s444_s28  ;;  %v453_v16 = vld [vmem:[%s573_s4] ss:$0 sm:$0xff] }
   0xf   : > { %v243_v10 = vld [vmem:[%s232_s6] sm:$0xff]  ;;  %s236_s14 = scalar_lea.vmem %s574_s5, %s444_s28 }
  0x10   : > { %463 = vmatpush3.bf16.msra.mxu0 %v266_v6  ;;  %471 = vmatpush3.bf16.msra.mxu1 %v321_v7  ;;  %v238_v11 = vld [vmem:[%s228_s9] sm:$0xff]  ;;  %v244_v12 = vpack.c.bf16 %v243_v10, %v243_v10 }
  0x11   : > { %464 = vmatprep.subr.bf16.mxu0 %v501_v1  ;;  %472 = vmatprep.subr.bf16.mxu1 %v501_v1  ;;  %v239_v13 = vpack.c.bf16 %v238_v11, %v238_v11 }
  0x14   : > { %465 = vmatpush3.bf16.msra.mxu0 %v491_v8  ;;  %473 = vmatpush3.bf16.msra.mxu1 %v492_v9 }
  0x17   : > { %467 = vmatmul.mubr.msk.bf16.vlgmr.msra.gmra.mxu0 %vm257_vm3, %v244_v12  ;;  %475 = vmatmul.mubr.msk.bf16.vlgmr.msra.gmra.mxu1 %vm257_vm3, %v239_v13 }
  0xd7   : > { %v302_v14 = vpop.f32.mrf.mxu0  ;;  %v357_v15 = vpop.f32.mrf.mxu1 }
  0xd8   : > { %v358_v17 = vadd.f32 %v357_v15, %v302_v14 }
  0xd9   : > { %v468_v18 = vpop.f32.mrf.mxu0  ;;  %v476_v19 = vpop.f32.mrf.mxu1 }
  0xda   : > { %v370_v20 = vadd.f32 %v453_v16, %v358_v17 }
  0xdb   : > { %v305_v21 = vpop.f32.mrf.mxu0  ;;  %v360_v22 = vpop.f32.mrf.mxu1 }
  0xdc   : > { %v371_v23 = vmax.f32 %v370_v20, 0.0 }
  0xdd   : > { %v469_v24 = vpop.f32.mrf.mxu0  ;;  %v477_v25 = vpop.f32.mrf.mxu1 }
  0xde   : > { %373 = vst.msk [vmem:[%s236_s14] sm:$0xff] %vm372_vm4, %v371_v23 }
  0xdf PF: > { %s15_s18 = sadd.s32 1, %s499_s18  }
  0xe0   : > { %p12_p4 = scmp.ge.s32.totalorder %s15_s18, 4  }
  0xe2   :  { %14 = sbr.rel (!%p12_p4) target bundleno = 1 (0x1), region = 73 }

// kernel: graph_enc_dec_forward.27
= control target key start
LH: loop header
LB: loop body
LE: loop exit
PB: predicated region body
PF: predicated region fallthrough
CT: control target
= control target key end

     0   :  { %s509_s21 = smov 0   ;;  %s544_s0 = inlined_call_operand.vmem [shape: f32[16,23], index: 0, kind: input, shape index: {}]   ;;  %s545_s1 = inlined_call_operand.vmem [shape: bf16[23,32], index: 1, kind: input, shape index: {}]   ;;  %s546_s2 = inlined_call_operand.vmem [shape: f32[1,32], index: 2, kind: input, shape index: {}]   ;;  %s547_s3 = inlined_call_operand.vmem [shape: f32[16,32], index: 3, kind: input, shape index: {}]   ;;  %s548_s4 = inlined_call_operand.vmem [shape: f32[1,32], index: 4, kind: input, shape index: {}]   ;;  %s549_s5 = inlined_call_operand.vmem [shape: f32[1,32], index: 5, kind: input, shape index: {}]   ;;  %s550_s6 = inlined_call_operand.vmem [shape: f32[16,32], index: 6, kind: output, shape index: {}]  }
   0x1 LB: > { %s423_s22 = sadd.s32 4294967295, %s469_s21   ;;  %p427_p0 = scmp.ge.s32.totalorder %s469_s21, 1  ;;  %s469_s21 = sphi %s509_s21, %s16_s21  }
   0x2   : > { %p220_p1 = scmp.lt.s32.totalorder %s469_s21, 3 }
   0x4   : > { %p221_p2 = pnand %p427_p0, %p220_p1 }
   0x5   : > { %p252_p3 = scmp.lt.s32.totalorder (!%p221_p2), %s423_s22, 1 }
   0x6   : > { %224 = sbr.rel (%p221_p2) target bundleno = 227 (0xe3), region = 44 }
   0xb   : > { %v461_v0 = vld [vmem:[%s545_s1 + $0x8] ss:$0 sps:$4 sm:$0xff]   ;;  %vm290_vm0 = vcmask 1042432   ;;  %v471_v1 = vmov 0.0   ;;  %vm291_vm1 = vcmask 1043456   ;;  %v472_v2 = vmov 65535  }
   0xc   : > { %442 = vmatprep.subr.bf16.mxu0 %v471_v1  ;;  %v292_v3 = vsel %vm290_vm0, 4294967295, %v472_v2  ;;  %vm473_vm2 = vmmov 0   ;;  %s552_s22 = smov (!%p252_p3, %s423_s22), 1  ;;  %v462_v6 = vld [vmem:[%s545_s1] sm:$0xff]   ;;  %vm286_vm3 = vcmask 187392   ;;  %vm356_vm4 = vcmask 261120  }
   0xd   : > { %v293_v4 = vsel %vm291_vm1, %v292_v3, 0  ;;  %446 = vmatprep.mubr.msk.bf16.mxu0 %vm473_vm2, %v471_v1  ;;  %s428_s27 = sshll.u32 %s552_s22, 3  ;;  %v431_v9 = vld [vmem:[%s546_s2] ss:$0 sm:$0xff] }
   0xe   : > { %v295_v5 = vand.u32 %v461_v0, %v293_v4  ;;  %s255_s30 = scalar_lea.vmem %s544_s0, %s428_s27  ;;  %s259_s11 = scalar_lea.vmem %s547_s3, %s428_s27  ;;  %v435_v15 = vld [vmem:[%s548_s4] ss:$0 sm:$0xff] }
   0xf   : > { %v265_v7 = vld [vmem:[%s255_s30] sm:$0xff]  ;;  %s263_s18 = scalar_lea.vmem %s550_s6, %s428_s27 }
  0x10   : > { %443 = vmatpush3.bf16.msra.mxu0 %v295_v5  ;;  %v266_v8 = vpack.c.bf16 %v265_v7, %v265_v7  ;;  %v338_v12 = vld [vmem:[%s259_s11] sm:$0xff] }
  0x11   : > { %444 = vmatprep.subr.bf16.mxu0 %v471_v1  ;;  %v436_v18 = vld [vmem:[%s549_s5] ss:$0 sm:$0xff] }
  0x14   : > { %445 = vmatpush3.bf16.msra.mxu0 %v462_v6 }
  0x17   : > { %447 = vmatmul.mubr.msk.bf16.vlgmr.msra.gmra.mxu0 %vm286_vm3, %v266_v8 }
  0xd7   : > { %v331_v10 = vpop.f32.mrf.mxu0 }
  0xd8   : > { %v332_v11 = vadd.f32 %v431_v9, %v331_v10 }
  0xd9   : > { %v448_v13 = vpop.f32.mrf.mxu0 }
  0xda   : > { %v337_v14 = vmax.f32 %v332_v11, 0.0 }
  0xdb   : > { %v334_v16 = vpop.f32.mrf.mxu0 }
  0xdc   : > { %v339_v17 = vadd.f32 %v338_v12, %v337_v14 }
  0xdd   : > { %v449_v19 = vpop.f32.mrf.mxu0 }
  0xde   : > { %v347_v20 = vmul.f32 %v435_v15, %v339_v17 }
  0xe0   : > { %v355_v21 = vadd.f32 %v436_v18, %v347_v20 }
  0xe2   : > { %357 = vst.msk [vmem:[%s263_s18] sm:$0xff] %vm356_vm4, %v355_v21 }
  0xe3 PF: > { %s16_s21 = sadd.s32 1, %s469_s21  }
  0xe4   : > { %p13_p4 = scmp.ge.s32.totalorder %s16_s21, 4  }
  0xe6   :  { %15 = sbr.rel (!%p13_p4) target bundleno = 1 (0x1), region = 77 }

// kernel: graph_enc_dec_forward.31
= control target key start
LH: loop header
LB: loop body
LE: loop exit
PB: predicated region body
PF: predicated region fallthrough
CT: control target
= control target key end

     0   :  { %s503_s21 = smov 0   ;;  %s540_s0 = inlined_call_operand.vmem [shape: f32[16,32], index: 0, kind: input, shape index: {}]   ;;  %s541_s1 = inlined_call_operand.vmem [shape: bf16[32,32], index: 1, kind: input, shape index: {}]   ;;  %s542_s2 = inlined_call_operand.vmem [shape: f32[1,32], index: 2, kind: input, shape index: {}]   ;;  %s543_s3 = inlined_call_operand.vmem [shape: f32[16,32], index: 3, kind: input, shape index: {}]   ;;  %s544_s4 = inlined_call_operand.vmem [shape: f32[1,32], index: 4, kind: input, shape index: {}]   ;;  %s545_s5 = inlined_call_operand.vmem [shape: f32[1,32], index: 5, kind: input, shape index: {}]   ;;  %s546_s6 = inlined_call_operand.vmem [shape: f32[16,32], index: 6, kind: output, shape index: {}]  }
   0x1 LB: > { %s419_s22 = sadd.s32 4294967295, %s464_s21   ;;  %p423_p0 = scmp.ge.s32.totalorder %s464_s21, 1  ;;  %s464_s21 = sphi %s503_s21, %s16_s21  }
   0x2   : > { %p220_p1 = scmp.lt.s32.totalorder %s464_s21, 3 }
   0x4   : > { %p221_p2 = pnand %p423_p0, %p220_p1 }
   0x5   : > { %p252_p3 = scmp.lt.s32.totalorder (!%p221_p2), %s419_s22, 1 }
   0x6   : > { %224 = sbr.rel (%p221_p2) target bundleno = 224 (0xe0), region = 44 }
   0xb   : > { %v456_v0 = vld [vmem:[%s541_s1 + $0x8] sm:$0xff]   ;;  %v466_v1 = vmov 0.0   ;;  %v457_v2 = vld [vmem:[%s541_s1] sm:$0xff]   ;;  %vm467_vm0 = vmmov 0   ;;  %s548_s22 = smov (!%p252_p3, %s419_s22), 1  ;;  %vm290_vm1 = vcmask 261120  }
   0xc   : > { %438 = vmatprep.subr.bf16.mxu0 %v466_v1  ;;  %442 = vmatprep.mubr.msk.bf16.mxu0 %vm467_vm0, %v466_v1  ;;  %s424_s27 = sshll.u32 %s548_s22, 3  ;;  %v427_v5 = vld [vmem:[%s542_s2] ss:$0 sm:$0xff] }
   0xd   : > { %439 = vmatpush3.bf16.msra.mxu0 %v456_v0  ;;  %s255_s30 = scalar_lea.vmem %s540_s0, %s424_s27  ;;  %s259_s11 = scalar_lea.vmem %s543_s3, %s424_s27  ;;  %v431_v11 = vld [vmem:[%s544_s4] ss:$0 sm:$0xff] }
   0xe   : > { %440 = vmatprep.subr.bf16.mxu0 %v466_v1  ;;  %v265_v3 = vld [vmem:[%s255_s30] sm:$0xff]  ;;  %s263_s18 = scalar_lea.vmem %s546_s6, %s424_s27 }
   0xf   : > { %v266_v4 = vpack.c.bf16 %v265_v3, %v265_v3  ;;  %v335_v8 = vld [vmem:[%s259_s11] sm:$0xff] }
  0x10   : > { %v432_v14 = vld [vmem:[%s545_s5] ss:$0 sm:$0xff] }
  0x11   : > { %441 = vmatpush3.bf16.msra.mxu0 %v457_v2 }
  0x14   : > { %443 = vmatmul.mubr.msk.bf16.vlgmr.msra.gmra.mxu0 %vm290_vm1, %v266_v4 }
  0xd4   : > { %v328_v6 = vpop.f32.mrf.mxu0 }
  0xd5   : > { %v329_v7 = vadd.f32 %v427_v5, %v328_v6 }
  0xd6   : > { %v444_v9 = vpop.f32.mrf.mxu0 }
  0xd7   : > { %v334_v10 = vmax.f32 %v329_v7, 0.0 }
  0xd8   : > { %v331_v12 = vpop.f32.mrf.mxu0 }
  0xd9   : > { %v336_v13 = vadd.f32 %v335_v8, %v334_v10 }
  0xda   : > { %v445_v15 = vpop.f32.mrf.mxu0 }
  0xdb   : > { %v344_v16 = vmul.f32 %v431_v11, %v336_v13 }
  0xdd   : > { %v352_v17 = vadd.f32 %v432_v14, %v344_v16 }
  0xdf   : > { %353 = vst.msk [vmem:[%s263_s18] sm:$0xff] %vm290_vm1, %v352_v17 }
  0xe0 PF: > { %s16_s21 = sadd.s32 1, %s464_s21  }
  0xe1   : > { %p13_p4 = scmp.ge.s32.totalorder %s16_s21, 4  }
  0xe3   :  { %15 = sbr.rel (!%p13_p4) target bundleno = 1 (0x1), region = 77 }

// kernel: graph_enc_dec_forward.29
= control target key start
LH: loop header
LB: loop body
LE: loop exit
PB: predicated region body
PF: predicated region fallthrough
CT: control target
= control target key end

     0   :  { %s593_s21 = smov 0   ;;  %s634_s0 = inlined_call_operand.vmem [shape: f32[16,32], index: 0, kind: input, shape index: {}]   ;;  %s635_s1 = inlined_call_operand.vmem [shape: bf16[32,32], index: 1, kind: input, shape index: {}]   ;;  %s636_s2 = inlined_call_operand.vmem [shape: f32[16,32], index: 2, kind: input, shape index: {}, may-alias: {2,5}]   ;;  %s637_s3 = inlined_call_operand.vmem [shape: bf16[32,32], index: 3, kind: input, shape index: {}]   ;;  %s638_s4 = inlined_call_operand.vmem [shape: f32[1,32], index: 4, kind: input, shape index: {}]   ;;  %s639_s5 = inlined_call_operand.vmem [shape: f32[16,32], index: 5, kind: input, shape index: {}, may-alias: {2,5}]   ;;  %s640_s6 = inlined_call_operand.vmem [shape: f32[16,32], index: 6, kind: output, shape index: {}]  }
   0x1 LB: > { %s494_s22 = sadd.s32 4294967295, %s554_s21   ;;  %p498_p0 = scmp.ge.s32.totalorder %s554_s21, 1  ;;  %s554_s21 = sphi %s593_s21, %s16_s21  }
   0x2   : > { %p229_p1 = scmp.lt.s32.totalorder %s554_s21, 3 }
   0x4   : > { %p230_p2 = pnand %p498_p0, %p229_p1 }
   0x5   : > { %p265_p3 = scmp.lt.s32.totalorder (!%p230_p2), %s494_s22, 1 }
   0x6   : > { %233 = sbr.rel (%p230_p2) target bundleno = 223 (0xdf), region = 44 }
   0xb   : > { %v544_v0 = vld [vmem:[%s637_s3 + $0x8] sm:$0xff]   ;;  %v556_v1 = vmov 0.0   ;;  %v546_v3 = vld [vmem:[%s637_s3] sm:$0xff]   ;;  %vm557_vm0 = vmmov 0   ;;  %s642_s22 = smov (!%p265_p3, %s494_s22), 1  ;;  %vm306_vm1 = vcmask 261120  }
   0xc   : > { %518 = vmatprep.subr.bf16.mxu0 %v556_v1  ;;  %526 = vmatprep.subr.bf16.mxu1 %v556_v1  ;;  %v545_v2 = vld [vmem:[%s635_s1 + $0x8] sm:$0xff]   ;;  %v547_v4 = vld [vmem:[%s635_s1] sm:$0xff]   ;;  %s499_s7 = sshll.u32 %s642_s22, 3 }
   0xd   : > { %519 = vmatpush3.bf16.msra.mxu0 %v544_v0  ;;  %522 = vmatprep.mubr.msk.bf16.mxu0 %vm557_vm0, %v556_v1  ;;  %s272_s10 = scalar_lea.vmem %s636_s2, %s499_s7  ;;  %s268_s13 = scalar_lea.vmem %s634_s0, %s499_s7  ;;  %v509_v11 = vld [vmem:[%s638_s4] ss:$0 sm:$0xff] }
   0xe   : > { %527 = vmatpush3.bf16.msra.mxu1 %v545_v2  ;;  %520 = vmatprep.subr.bf16.mxu0 %v556_v1  ;;  %v288_v5 = vld [vmem:[%s272_s10] sm:$0xff]  ;;  %s276_s18 = scalar_lea.vmem %s639_s5, %s499_s7  ;;  %s280_s22 = scalar_lea.vmem %s640_s6, %s499_s7 }
   0xf   : > { %528 = vmatprep.subr.bf16.mxu1 %v556_v1  ;;  %530 = vmatprep.mubr.msk.bf16.mxu1 %vm557_vm0, %v556_v1  ;;  %v282_v6 = vld [vmem:[%s268_s13] sm:$0xff]  ;;  %v289_v7 = vpack.c.bf16 %v288_v5, %v288_v5 }
  0x10   : > { %v283_v8 = vpack.c.bf16 %v282_v6, %v282_v6  ;;  %v414_v16 = vld [vmem:[%s276_s18] sm:$0xff] }
  0x11   : > { %521 = vmatpush3.bf16.msra.mxu0 %v546_v3 }
  0x12   : > { %529 = vmatpush3.bf16.msra.mxu1 %v547_v4 }
  0x14   : > { %523 = vmatmul.mubr.msk.bf16.vlgmr.msra.gmra.mxu0 %vm306_vm1, %v289_v7 }
  0x15   : > { %531 = vmatmul.mubr.msk.bf16.vlgmr.msra.gmra.mxu1 %vm306_vm1, %v283_v8 }
  0xd4   : > { %v344_v9 = vpop.f32.mrf.mxu0 }
  0xd5   : > { %v399_v10 = vpop.f32.mrf.mxu1 }
  0xd6   : > { %v400_v12 = vadd.f32 %v399_v10, %v344_v9  ;;  %v524_v13 = vpop.f32.mrf.mxu0 }
  0xd7   : > { %v532_v14 = vpop.f32.mrf.mxu1 }
  0xd8   : > { %v412_v15 = vadd.f32 %v509_v11, %v400_v12  ;;  %v347_v17 = vpop.f32.mrf.mxu0 }
  0xd9   : > { %v402_v18 = vpop.f32.mrf.mxu1 }
  0xda   : > { %v413_v19 = vmax.f32 %v412_v15, 0.0  ;;  %v525_v20 = vpop.f32.mrf.mxu0 }
  0xdb   : > { %v533_v21 = vpop.f32.mrf.mxu1 }
  0xdc   : > { %v415_v22 = vadd.f32 %v414_v16, %v413_v19 }
  0xde   : > { %416 = vst.msk [vmem:[%s280_s22] sm:$0xff] %vm306_vm1, %v415_v22 }
  0xdf PF: > { %s16_s21 = sadd.s32 1, %s554_s21  }
  0xe0   : > { %p13_p4 = scmp.ge.s32.totalorder %s16_s21, 4  }
  0xe2   :  { %15 = sbr.rel (!%p13_p4) target bundleno = 1 (0x1), region = 80 }

// kernel: graph_enc_dec_forward.28
= control target key start
LH: loop header
LB: loop body
LE: loop exit
PB: predicated region body
PF: predicated region fallthrough
CT: control target
= control target key end

     0   :  { %s481_s15 = smov 0   ;;  %s516_s0 = inlined_call_operand.vmem [shape: bf16[28,49], index: 0, kind: input, shape index: {}]   ;;  %s517_s1 = inlined_call_operand.vmem [shape: bf16[49,32], index: 1, kind: input, shape index: {}]   ;;  %s518_s2 = inlined_call_operand.vmem [shape: f32[1,32], index: 2, kind: input, shape index: {}]   ;;  %s519_s3 = inlined_call_operand.vmem [shape: f32[28,32], index: 3, kind: input, shape index: {}]   ;;  %s520_s4 = inlined_call_operand.vmem [shape: f32[28,32], index: 4, kind: output, shape index: {}]  }
   0x1 LB: > { %s392_s16 = sadd.s32 4294967295, %s451_s15   ;;  %p396_p0 = scmp.ge.s32.totalorder %s451_s15, 1  ;;  %s451_s15 = sphi %s481_s15, %s14_s15  }
   0x2   : > { %p174_p1 = scmp.lt.s32.totalorder %s451_s15, 3 }
   0x4   : > { %p175_p2 = pnand %p396_p0, %p174_p1 }
   0x5   : > { %s397_s19 = sshll.u32 (!%p175_p2), %s392_s16, 1 }
   0x6   : > { %178 = sbr.rel (%p175_p2) target bundleno = 232 (0xe8), region = 36  ;;  %p206_p3 = scmp.lt.s32.totalorder (!%p175_p2), %s397_s19, 3 }
   0xb   : > { %v440_v0 = vld [vmem:[%s517_s1 + $0x18] ss:$0 sps:$4 sm:$0x11]   ;;  %v453_v1 = vmov 0.0   ;;  %vm270_vm0 = vcmask 1040384   ;;  %v454_v2 = vmov 0  }
   0xc   : > { %417 = vmatprep.subr.bf16.mxu0 %v453_v1  ;;  %v272_v3 = vsel %vm270_vm0, 65535, %v454_v2  ;;  %vm455_vm1 = vmmov 0   ;;  %v441_v5 = vld [vmem:[%s517_s1 + $0x10] sm:$0xff]   ;;  %s522_s19 = smov (!%p206_p3, %s397_s19), 3  ;;  %v442_v6 = vld [vmem:[%s517_s1 + $0x8] sm:$0xff]   ;;  %v443_v7 = vld [vmem:[%s517_s1] sm:$0xff]  }
   0xd   : > { %v274_v4 = vand.u32 %v440_v0, %v272_v3  ;;  %425 = vmatprep.mubr.msk.bf16.mxu0 %vm455_vm1, %v453_v1  ;;  %s398_s24 = sshll.u32 %s522_s19, 2  ;;  %vm266_vm2 = vcmask 400384   ;;  %s400_s30 = sshll.u32 %s522_s19, 3  ;;  %v403_v9 = vld [vmem:[%s518_s2] ss:$0 sm:$0xff]  ;;  %vm321_vm3 = vcmask 261120  }
   0xe   : > { %s209_s27 = scalar_lea.vmem %s516_s0, %s398_s24  ;;  %s215_s7 = scalar_lea.vmem %s519_s3, %s400_s30 }
   0xf   : > { %418 = vmatpush3.bf16.msra.mxu0 %v274_v4  ;;  %v444_v8 = vld [vmem:[%s209_s27] sm:$0xff]   ;;  %s221_s12 = scalar_lea.vmem %s520_s4, %s400_s30  ;;  %v318_v16 = vld [vmem:[%s215_s7 + $0x8] sm:$0xff] }
  0x10   : > { %419 = vmatprep.subr.bf16.mxu0 %v453_v1  ;;  %v317_v11 = vld [vmem:[%s215_s7] sm:$0xff] }
  0x13   : > { %420 = vmatpush3.bf16.msra.mxu0 %v441_v5 }
  0x14   : > { %421 = vmatprep.subr.bf16.mxu0 %v453_v1 }
  0x17   : > { %422 = vmatpush3.bf16.msra.mxu0 %v442_v6 }
  0x18   : > { %423 = vmatprep.subr.bf16.mxu0 %v453_v1 }
  0x1b   : > { %424 = vmatpush3.bf16.msra.mxu0 %v443_v7 }
  0x1e   : > { %426 = vmatmul.mubr.msk.bf16.vlgmr.msra.gmra.mxu0 %vm266_vm2, %v444_v8 }
  0xde   : > { %v310_v10 = vpop.f32.mrf.mxu0 }
  0xdf   : > { %v311_v12 = vadd.f32 %v403_v9, %v310_v10 }
  0xe0   : > { %v427_v13 = vpop.f32.mrf.mxu0 }
  0xe1   : > { %v319_v14 = vadd.f32 %v317_v11, %v311_v12 }
  0xe2   : > { %v313_v15 = vpop.f32.mrf.mxu0 }
  0xe3   : > { %322 = vst.msk [vmem:[%s221_s12] sm:$0xff] %vm321_vm3, %v319_v14  ;;  %v314_v17 = vadd.f32 %v403_v9, %v313_v15 }
  0xe4   : > { %v428_v18 = vpop.f32.mrf.mxu0 }
  0xe5   : > { %v320_v19 = vadd.f32 %v318_v16, %v314_v17 }
  0xe7   : > { %323 = vst.msk [vmem:[%s221_s12 + $0x8] sm:$0xff] %vm321_vm3, %v320_v19 }
  0xe8 PF: > { %s14_s15 = sadd.s32 1, %s451_s15  }
  0xe9   : > { %p11_p4 = scmp.ge.s32.totalorder %s14_s15, 4  }
  0xeb   :  { %13 = sbr.rel (!%p11_p4) target bundleno = 1 (0x1), region = 69 }

// kernel: graph_enc_dec_forward.47
= control target key start
LH: loop header
LB: loop body
LE: loop exit
PB: predicated region body
PF: predicated region fallthrough
CT: control target
= control target key end

     0   :  { %s728_s30 = smov 0   ;;  %s784_s0 = inlined_call_operand.vmem [shape: f32[16,32], index: 0, kind: input, shape index: {}]   ;;  %s785_s1 = inlined_call_operand.vmem [shape: bf16[32,32], index: 1, kind: input, shape index: {}]   ;;  %s786_s2 = inlined_call_operand.vmem [shape: f32[1,32], index: 2, kind: input, shape index: {}]   ;;  %s787_s3 = inlined_call_operand.vmem [shape: f32[16,32], index: 3, kind: input, shape index: {}]   ;;  %s788_s4 = inlined_call_operand.vmem [shape: f32[1,32], index: 4, kind: input, shape index: {}]   ;;  %s789_s5 = inlined_call_operand.vmem [shape: f32[1,32], index: 5, kind: input, shape index: {}]   ;;  %s790_s6 = inlined_call_operand.vmem [shape: bf16[32,6], index: 6, kind: input, shape index: {}]   ;;  %s791_s7 = inlined_call_operand.vmem [shape: f32[1,6], index: 7, kind: input, shape index: {}]   ;;  %s792_s8 = inlined_call_operand.vmem [shape: f32[16,32], index: 8, kind: output, shape index: {0}]   ;;  %s793_s9 = inlined_call_operand.vmem [shape: f32[16,6], index: 9, kind: output, shape index: {1}]  }
   0x1 LB: > { %s611_s10 = sadd.s32 4294967295, %s674_s30   ;;  %p615_p0 = scmp.ge.s32.totalorder %s674_s30, 1  ;;  %s674_s30 = sphi %s728_s30, %s20_s30  }
   0x2   : > { %p298_p1 = scmp.lt.s32.totalorder %s674_s30, 3 }
   0x4   : > { %p299_p2 = pnand %p615_p0, %p298_p1 }
   0x5   : > { %p340_p3 = scmp.lt.s32.totalorder (!%p299_p2), %s611_s10, 1 }
   0x6   : > { %302 = sbr.rel (%p299_p2) target bundleno = 424 (0x1a8), region = 52 }
   0xb   : > { %v664_v0 = vld [vmem:[%s785_s1 + $0x8] sm:$0xff]   ;;  %v676_v1 = vmov 0.0   ;;  %v665_v2 = vld [vmem:[%s785_s1] sm:$0xff]   ;;  %vm677_vm0 = vmmov 0   ;;  %s795_s10 = smov (!%p340_p3, %s611_s10), 1  ;;  %vm382_vm1 = vcmask 261120  }
   0xc   : > { %638 = vmatprep.subr.bf16.mxu0 %v676_v1  ;;  %646 = vmatprep.subr.bf16.mxu1 %v676_v1  ;;  %s742_s15 = sshll.u32 %s795_s10, 3  ;;  %v666_v5 = vld [vmem:[%s790_s6 + $0x8] sm:$0xff]   ;;  %v667_v6 = vld [vmem:[%s790_s6] sm:$0xff]   ;;  %vm513_vm2 = vcmask 48128  }
   0xd   : > { %639 = vmatpush3.bf16.msra.mxu0 %v664_v0  ;;  %642 = vmatprep.mubr.msk.bf16.mxu0 %vm677_vm0, %v676_v1  ;;  %s343_s18 = scalar_lea.vmem %s784_s0, %s742_s15  ;;  %v620_v7 = vld [vmem:[%s786_s2] ss:$0 sm:$0xff]  ;;  %s347_s27 = scalar_lea.vmem %s787_s3, %s742_s15 }
   0xe   : > { %640 = vmatprep.subr.bf16.mxu0 %v676_v1  ;;  %650 = vmatprep.mubr.msk.bf16.mxu1 %vm677_vm0, %v676_v1  ;;  %v357_v3 = vld [vmem:[%s343_s18] sm:$0xff]  ;;  %s351_s14 = scalar_lea.vmem %s792_s8, %s742_s15  ;;  %s355_s20 = scalar_lea.vmem %s793_s9, %s742_s15 }
   0xf   : > { %v358_v4 = vpack.c.bf16 %v357_v3, %v357_v3  ;;  %647 = vmatpush3.bf16.msra.mxu1 %v666_v5  ;;  %v427_v10 = vld [vmem:[%s347_s27] sm:$0xff] }
  0x10   : > { %648 = vmatprep.subr.bf16.mxu1 %v676_v1  ;;  %v624_v13 = vld [vmem:[%s788_s4] ss:$0 sm:$0xff] }
  0x11   : > { %641 = vmatpush3.bf16.msra.mxu0 %v665_v2  ;;  %v625_v16 = vld [vmem:[%s789_s5] ss:$0 sm:$0xff] }
  0x12   : > { %v626_v21 = vld [vmem:[%s791_s7] ss:$0 sm:$0xff] }
  0x13   : > { %649 = vmatpush3.bf16.msra.mxu1 %v667_v6 }
  0x14   : > { %643 = vmatmul.mubr.msk.bf16.vlgmr.msra.gmra.mxu0 %vm382_vm1, %v358_v4 }
  0xd4   : > { %v420_v8 = vpop.f32.mrf.mxu0 }
  0xd5   : > { %v421_v9 = vadd.f32 %v620_v7, %v420_v8 }
  0xd6   : > { %v644_v11 = vpop.f32.mrf.mxu0 }
  0xd7   : > { %v426_v12 = vmax.f32 %v421_v9, 0.0 }
  0xd8   : > { %v423_v14 = vpop.f32.mrf.mxu0 }
  0xd9   : > { %v428_v15 = vadd.f32 %v427_v10, %v426_v12 }
  0xda   : > { %v645_v17 = vpop.f32.mrf.mxu0 }
  0xdb   : > { %v436_v18 = vmul.f32 %v624_v13, %v428_v15 }
  0xdd   : > { %v444_v19 = vadd.f32 %v625_v16, %v436_v18 }
  0xdf   : > { %445 = vst.msk [vmem:[%s351_s14] sm:$0xff] %vm382_vm1, %v444_v19  ;;  %v446_v20 = vpack.c.bf16 %v444_v19, %v444_v19 }
  0xe1   : > { %651 = vmatmul.mubr.msk.bf16.vlgmr.msra.gmra.mxu1 %vm382_vm1, %v446_v20 }
 0x1a1   : > { %v507_v22 = vpop.f32.mrf.mxu1 }
 0x1a2   : > { %v508_v23 = vadd.f32 %v626_v21, %v507_v22 }
 0x1a3   : > { %v652_v24 = vpop.f32.mrf.mxu1 }
 0x1a4   : > { %514 = vst.msk [vmem:[%s355_s20] sm:$0xff] %vm513_vm2, %v508_v23 }
 0x1a5   : > { %v510_v25 = vpop.f32.mrf.mxu1 }
 0x1a7   : > { %v653_v26 = vpop.f32.mrf.mxu1 }
 0x1a8 PF: > { %s20_s30 = sadd.s32 1, %s674_s30  }
 0x1a9   : > { %p17_p4 = scmp.ge.s32.totalorder %s20_s30, 4  }
 0x1ab   :  { %19 = sbr.rel (!%p17_p4) target bundleno = 1 (0x1), region = 97 }

</bundles_post_ra>
